<compile_context>
chip_gen: v7x
topology: tpu7x:2x2x1
jax: 0.10.0
libtpu: 0.0.40
codegen_flags: <defaults>
</compile_context>

<pallas_src>
import numpy as np

import jax
import jax.numpy as jnp
from jax.experimental import pallas as pl
from jax.experimental.pallas import tpu as pltpu


def _elu(x):
    # torch.nn.functional.elu (alpha=1.0).  The exp argument is clamped so the
    # unselected branch never evaluates exp on large positive x.
    # TODO(synk): jnp.expm1 would be marginally more accurate for tiny |x|;
    # guarded exp keeps the guaranteed Mosaic EUP lowering path.
    return jnp.where(x > 0, x, jnp.exp(jnp.minimum(x, 0.0)) - 1.0)


def _make_kernel(tb, S, max_ks, kernel_sizes, F, KF_pad):
    """Fused head kernel for one tile of `tb` whole sequences."""
    rows = tb * S

    def kernel(x_ref, w0_ref, b0_ref, wc_ref, bc_ref,
               w1_ref, b1_ref, w2_ref, b2_ref, o_ref):
        x = x_ref[...]                                             # [rows, 768] bf16

        # l0 + ELU  (d0 dropout: identity at inference); f32 accumulation.
        h = _elu(jnp.dot(x, w0_ref[...],
                         preferred_element_type=jnp.float32) + b0_ref[...])  # [rows, Hd] f32

        # im2col via XLU sublane rolls: windows[r, k*Hd:(k+1)*Hd] = h[r + k].
        # The roll wraps across sequence boundaries inside the tile; every
        # wrapped row has position t > S - ks and is zeroed by the validity
        # mask below, so the wrap is harmless.
        # TODO(synk): roll is done in f32 (packed-bf16 sublane rolls by odd
        # shifts are a riskier lowering path); each part is cast to bf16
        # immediately after so the concatenated windows stay half-width.
        parts = [h.astype(jnp.bfloat16)]
        for k in range(1, max_ks):
            parts.append(pltpu.roll(h, shift=rows - k, axis=0).astype(jnp.bfloat16))
        windows = jnp.concatenate(parts, axis=1)                   # [rows, max_ks*Hd] bf16

        # All conv branches in ONE MXU pass: K = max_ks*Hd, N = KF_pad.
        conv = jnp.dot(windows, wc_ref[...],
                       preferred_element_type=jnp.float32)
        conv = jnp.maximum(conv + bc_ref[...], 0.0)                # ReLU, [rows, KF_pad] f32
        conv = conv.reshape(tb, S, KF_pad)                         # free view: S % 8 == 0

        # In-kernel validity mask (replaces the DMA'd mask input): columns of
        # branch i (i*F .. (i+1)*F) are valid for positions t <= S - ks_i.
        # Padded feature columns carry zero weights/bias, so they pool to 0
        # and hit zero-padded w1 rows -> no effect.  Masking AFTER ReLU is
        # safe because ReLU output >= 0 (wrapper asserts S >= max kernel size).
        col = jax.lax.broadcasted_iota(jnp.int32, (1, 1, KF_pad), 2)
        thresh = jnp.zeros((1, 1, KF_pad), jnp.int32)
        for i, ks in enumerate(kernel_sizes):
            in_branch = (col >= i * F) & (col < (i + 1) * F)
            thresh = jnp.where(in_branch, S - ks, thresh)
        pos = jax.lax.broadcasted_iota(jnp.int32, (tb, S, KF_pad), 1)
        conv = jnp.where(pos <= thresh, conv, 0.0)

        # max_pool1d over the full valid temporal extent, per sequence.
        cat = jnp.max(conv, axis=1)                                # [tb, KF_pad] f32

        # l1 + ELU  (d1 dropout: identity at inference), then fc.
        z = _elu(jnp.dot(cat.astype(jnp.bfloat16), w1_ref[...],
                         preferred_element_type=jnp.float32) + b1_ref[...])  # [tb, Hd]
        logits = jnp.dot(z.astype(jnp.bfloat16), w2_ref[...],
                         preferred_element_type=jnp.float32) + b2_ref[...]   # [tb, C_pad]
        o_ref[...] = logits.astype(o_ref.dtype)                    # sublane+lane dense store

    return kernel


def adpt_head_pallas(hidden_state, params, kernel_sizes, num_filters, num_classes,
                     target_rows=512):
    B, S, E = hidden_state.shape
    Hd = params["w0"].shape[1]
    K = len(kernel_sizes)
    F = num_filters
    max_ks = max(kernel_sizes)
    KF = K * F
    KF_pad = pl.cdiv(KF, 128) * 128          # lane-dense conv-feature width
    C_pad = pl.cdiv(num_classes, 128) * 128  # lane-dense logits width

    assert S % 8 == 0, "sequence length must be a multiple of 8 (sublane tile)"
    assert S >= max_ks, "sequence shorter than the largest conv kernel size"

    # Sequences per grid step.  Each step processes whole sequences so no
    # cross-tile halo / pooled-max accumulator is needed and every step is
    # independent ("parallel" grid axis).  tb is a multiple of 8 so the tail
    # matmuls and the logits store are sublane-aligned.  target_rows keeps the
    # per-step x tile small enough for the default scoped VMEM limit on every
    # generation (v7x 32 MiB default, v5e 16 MiB).
    tb = max(8, (target_rows // S) // 8 * 8)
    tb = min(tb, pl.cdiv(B, 8) * 8)
    n_steps = pl.cdiv(B, tb)
    B_pad = n_steps * tb

    # ---------------- host-side repacking (one-time setup; cache in practice) ----------------
    x2d = hidden_state.reshape(B * S, E).astype(jnp.bfloat16)
    if B_pad != B:
        x2d = jnp.pad(x2d, ((0, (B_pad - B) * S), (0, 0)))   # zero pad sequences; sliced off later

    # Combined conv weight [max_ks*Hd, KF_pad]; unused taps / padded feature
    # columns are zero, so they contribute nothing.
    wc_np = np.zeros((max_ks * Hd, KF_pad), np.float32)
    bc_np = np.zeros((1, KF_pad), np.float32)
    for i, ks in enumerate(kernel_sizes):
        w = np.asarray(params[f"wc{ks}"], np.float32)         # [ks, Hd, F]
        b = np.asarray(params[f"bc{ks}"], np.float32)         # [1, F]
        for k in range(ks):
            wc_np[k * Hd:(k + 1) * Hd, i * F:(i + 1) * F] = w[k]
        bc_np[0, i * F:(i + 1) * F] = b[0]
    w1_np = np.zeros((KF_pad, Hd), np.float32)
    w1_np[:KF, :] = np.asarray(params["w1"], np.float32)
    w2_np = np.zeros((Hd, C_pad), np.float32)
    w2_np[:, :num_classes] = np.asarray(params["w2"], np.float32)
    b2_np = np.zeros((1, C_pad), np.float32)
    b2_np[0, :num_classes] = np.asarray(params["b2"], np.float32)[0]

    w0 = params["w0"].astype(jnp.bfloat16)
    b0 = params["b0"].astype(jnp.float32)
    wc = jnp.asarray(wc_np).astype(jnp.bfloat16)
    bc = jnp.asarray(bc_np)
    w1 = jnp.asarray(w1_np).astype(jnp.bfloat16)
    b1 = params["b1"].astype(jnp.float32)
    w2 = jnp.asarray(w2_np).astype(jnp.bfloat16)
    b2 = jnp.asarray(b2_np)

    inputs = [x2d, w0, b0, wc, bc, w1, b1, w2, b2]

    # ---------------- pallas_call ----------------
    kernel = _make_kernel(tb, S, max_ks, tuple(kernel_sizes), F, KF_pad)

    flops = 2 * (B_pad * S * E * Hd                     # l0
                 + B_pad * S * (max_ks * Hd) * KF_pad   # fused conv
                 + B_pad * KF_pad * Hd                  # l1
                 + B_pad * Hd * C_pad)                  # fc
    transcendentals = B_pad * S * Hd + B_pad * Hd       # ELU exps
    bytes_accessed = int(sum(int(a.size) * a.dtype.itemsize for a in inputs)
                         + B_pad * C_pad * 4)

    def resident_spec(a):
        n = a.ndim
        return pl.BlockSpec(a.shape, lambda i, n=n: (0,) * n)

    in_specs = ([pl.BlockSpec((tb * S, E), lambda i: (i, 0))]     # streamed x tile
                + [resident_spec(a) for a in inputs[1:]])         # small weights

    out = pl.pallas_call(
        kernel,
        out_shape=jax.ShapeDtypeStruct((B_pad, C_pad), jnp.float32),
        grid=(n_steps,),
        in_specs=in_specs,
        out_specs=pl.BlockSpec((tb, C_pad), lambda i: (i, 0)),
        compiler_params=pltpu.CompilerParams(
            dimension_semantics=("parallel",)),                   # megacore on v7x
        cost_estimate=pl.CostEstimate(flops=int(flops),
                                      transcendentals=int(transcendentals),
                                      bytes_accessed=bytes_accessed),
    )(*inputs)
    return out[:B, :num_classes]


def adpt_head_ref(hidden_state, params, kernel_sizes, num_filters, num_classes):
    """Pure-JAX reference (same bf16-input / f32-accumulate policy as the kernel)."""
    bf16 = jnp.bfloat16
    x = hidden_state.astype(bf16)
    h = _elu(jnp.einsum("bse,eh->bsh", x, params["w0"].astype(bf16),
                        preferred_element_type=jnp.float32) + params["b0"][0])
    B, S, _ = h.shape
    hb = h.astype(bf16)
    pools = []
    for ks in kernel_sizes:
        wc = params[f"wc{ks}"].astype(bf16)                       # [ks, Hd, F]
        bc = params[f"bc{ks}"][0]
        lout = S - ks + 1
        acc = jnp.zeros((B, lout, num_filters), jnp.float32)
        for k in range(ks):
            acc = acc + jnp.einsum("bld,df->blf", hb[:, k:k + lout, :], wc[k],
                                   preferred_element_type=jnp.float32)
        acc = jnp.maximum(acc + bc, 0.0)
        pools.append(jnp.max(acc, axis=1))                        # [B, F]
    cat = jnp.concatenate(pools, axis=1).astype(bf16)             # [B, K*F]
    z = _elu(jnp.dot(cat, params["w1"].astype(bf16),
                     preferred_element_type=jnp.float32) + params["b1"][0])
    return jnp.dot(z.astype(bf16), params["w2"].astype(bf16),
                   preferred_element_type=jnp.float32) + params["b2"][0]


if __name__ == "__main__":
    B, S, E = 2, 16, 768          # l0 input dim is fixed at 768 by DistilBERT
    hidden_dim = 32
    num_filters = 16
    kernel_sizes = (2, 3, 4)
    num_classes = 5
    vocab = 100

    key = jax.random.PRNGKey(0)
    keys = jax.random.split(key, 16)

    input_ids = jax.random.randint(keys[0], (B, S), 0, vocab)
    attention_mask = jnp.ones((B, S), jnp.float32)

    # TODO(synk): the pretrained DistilBERT backbone cannot be reproduced without
    # its checkpoint; stand-in: deterministic embedding lookup masked by
    # attention_mask, producing hidden_state [B, S, 768] for the head kernel.
    emb_table = jax.random.normal(keys[1], (vocab, E), jnp.float32) * 0.05
    hidden_state = emb_table[input_ids] * attention_mask[..., None]

    params = {
        "w0": jax.random.normal(keys[2], (E, hidden_dim), jnp.float32) * 0.05,
        "b0": jax.random.normal(keys[3], (1, hidden_dim), jnp.float32) * 0.05,
        "w1": jax.random.normal(
            keys[4], (len(kernel_sizes) * num_filters, hidden_dim), jnp.float32) * 0.05,
        "b1": jax.random.normal(keys[5], (1, hidden_dim), jnp.float32) * 0.05,
        "w2": jax.random.normal(keys[6], (hidden_dim, num_classes), jnp.float32) * 0.05,
        "b2": jax.random.normal(keys[7], (1, num_classes), jnp.float32) * 0.05,
    }
    for i, ks in enumerate(kernel_sizes):
        params[f"wc{ks}"] = jax.random.normal(
            keys[8 + 2 * i], (ks, hidden_dim, num_filters), jnp.float32) * 0.05
        params[f"bc{ks}"] = jax.random.normal(
            keys[9 + 2 * i], (1, num_filters), jnp.float32) * 0.05

    out = adpt_head_pallas(hidden_state, params, kernel_sizes, num_filters, num_classes)
    out = jax.block_until_ready(out)

    ref = adpt_head_ref(hidden_state, params, kernel_sizes, num_filters, num_classes)
    assert out.shape == (B, num_classes), out.shape
    assert jnp.allclose(out, ref, atol=1e-3, rtol=1e-2), (out, ref)
    print("KERNEL_OK")
</pallas_src>

<mosaic_0001>
module attributes {stable_mosaic.version = 11 : i64} {
  func.func @kernel(%arg0: i32, %arg1: memref<128x768xbf16, #tpu.memory_space<vmem>>, %arg2: memref<768x32xbf16, #tpu.memory_space<vmem>>, %arg3: memref<1x32xf32, #tpu.memory_space<vmem>>, %arg4: memref<128x128xbf16, #tpu.memory_space<vmem>>, %arg5: memref<1x128xf32, #tpu.memory_space<vmem>>, %arg6: memref<128x32xbf16, #tpu.memory_space<vmem>>, %arg7: memref<1x32xf32, #tpu.memory_space<vmem>>, %arg8: memref<32x128xbf16, #tpu.memory_space<vmem>>, %arg9: memref<1x128xf32, #tpu.memory_space<vmem>>, %arg10: memref<8x128xf32, #tpu.memory_space<vmem>>) attributes {dimension_semantics = [#tpu.dimension_semantics<parallel>], iteration_bounds = array<i64: 1>, scalar_prefetch = 0 : i64, scratch_operands = 0 : i64, tpu.core_type = #tpu.core_type<tc>, window_params = [{transform_indices = @transform_0, window_bounds = array<i64: 128, 768>}, {pipeline_mode = #tpu.pipeline_mode<synchronous>, transform_indices = @transform_1, window_bounds = array<i64: 768, 32>}, {pipeline_mode = #tpu.pipeline_mode<synchronous>, transform_indices = @transform_2, window_bounds = array<i64: 1, 32>}, {pipeline_mode = #tpu.pipeline_mode<synchronous>, transform_indices = @transform_3, window_bounds = array<i64: 128, 128>}, {pipeline_mode = #tpu.pipeline_mode<synchronous>, transform_indices = @transform_4, window_bounds = array<i64: 1, 128>}, {pipeline_mode = #tpu.pipeline_mode<synchronous>, transform_indices = @transform_5, window_bounds = array<i64: 128, 32>}, {pipeline_mode = #tpu.pipeline_mode<synchronous>, transform_indices = @transform_6, window_bounds = array<i64: 1, 32>}, {pipeline_mode = #tpu.pipeline_mode<synchronous>, transform_indices = @transform_7, window_bounds = array<i64: 32, 128>}, {pipeline_mode = #tpu.pipeline_mode<synchronous>, transform_indices = @transform_8, window_bounds = array<i64: 1, 128>}, {transform_indices = @transform_9, window_bounds = array<i64: 8, 128>}]} {
    %c0 = arith.constant 0 : index
    %c0_0 = arith.constant 0 : index
    %0 = vector.load %arg1[%c0, %c0_0] : memref<128x768xbf16, #tpu.memory_space<vmem>>, vector<128x768xbf16>
    %c0_1 = arith.constant 0 : index
    %c0_2 = arith.constant 0 : index
    %1 = vector.load %arg2[%c0_1, %c0_2] : memref<768x32xbf16, #tpu.memory_space<vmem>>, vector<768x32xbf16>
    %cst = arith.constant dense<0.000000e+00> : vector<128x32xf32>
    %2 = tpu.matmul %0, %1, %cst {dimension_numbers = #tpu.dot_dimension_numbers<[1], [0], [0], [1], [0, 0, 1, 1], [], []>} : vector<128x768xbf16>, vector<768x32xbf16>, vector<128x32xf32> -> vector<128x32xf32>
    %c0_3 = arith.constant 0 : index
    %c0_4 = arith.constant 0 : index
    %3 = vector.load %arg3[%c0_3, %c0_4] : memref<1x32xf32, #tpu.memory_space<vmem>>, vector<1x32xf32>
    %4 = vector.broadcast %3 : vector<1x32xf32> to vector<128x32xf32>
    %5 = arith.addf %2, %4 : vector<128x32xf32>
    %cst_5 = arith.constant 0.000000e+00 : f32
    %6 = vector.broadcast %cst_5 : f32 to vector<128x32xf32>
    %7 = arith.cmpf ogt, %5, %6 : vector<128x32xf32>
    %cst_6 = arith.constant 0.000000e+00 : f32
    %8 = vector.broadcast %cst_6 : f32 to vector<128x32xf32>
    %9 = arith.minimumf %5, %8 : vector<128x32xf32>
    %10 = math.exp %9 : vector<128x32xf32>
    %cst_7 = arith.constant 1.000000e+00 : f32
    %11 = vector.broadcast %cst_7 : f32 to vector<128x32xf32>
    %12 = arith.subf %10, %11 : vector<128x32xf32>
    %13 = arith.select %7, %5, %12 : vector<128x32xi1>, vector<128x32xf32>
    %14 = arith.truncf %13 : vector<128x32xf32> to vector<128x32xbf16>
    %c127_i32 = arith.constant 127 : i32
    %15 = tpu.dynamic_rotate %13 by %c127_i32 dim 0 : vector<128x32xf32>, i32 -> vector<128x32xf32>
    %16 = arith.truncf %15 : vector<128x32xf32> to vector<128x32xbf16>
    %c126_i32 = arith.constant 126 : i32
    %17 = tpu.dynamic_rotate %13 by %c126_i32 dim 0 : vector<128x32xf32>, i32 -> vector<128x32xf32>
    %18 = arith.truncf %17 : vector<128x32xf32> to vector<128x32xbf16>
    %c125_i32 = arith.constant 125 : i32
    %19 = tpu.dynamic_rotate %13 by %c125_i32 dim 0 : vector<128x32xf32>, i32 -> vector<128x32xf32>
    %20 = arith.truncf %19 : vector<128x32xf32> to vector<128x32xbf16>
    %21 = tpu.concatenate %14, %16, %18, %20 in 1 : vector<128x32xbf16>, vector<128x32xbf16>, vector<128x32xbf16>, vector<128x32xbf16> -> vector<128x128xbf16>
    %c0_8 = arith.constant 0 : index
    %c0_9 = arith.constant 0 : index
    %22 = vector.load %arg4[%c0_8, %c0_9] : memref<128x128xbf16, #tpu.memory_space<vmem>>, vector<128x128xbf16>
    %cst_10 = arith.constant dense<0.000000e+00> : vector<128x128xf32>
    %23 = tpu.matmul %21, %22, %cst_10 {dimension_numbers = #tpu.dot_dimension_numbers<[1], [0], [0], [1], [0, 0, 1, 1], [], []>} : vector<128x128xbf16>, vector<128x128xbf16>, vector<128x128xf32> -> vector<128x128xf32>
    %c0_11 = arith.constant 0 : index
    %c0_12 = arith.constant 0 : index
    %24 = vector.load %arg5[%c0_11, %c0_12] : memref<1x128xf32, #tpu.memory_space<vmem>>, vector<1x128xf32>
    %25 = vector.broadcast %24 : vector<1x128xf32> to vector<128x128xf32>
    %26 = arith.addf %23, %25 : vector<128x128xf32>
    %cst_13 = arith.constant 0.000000e+00 : f32
    %27 = vector.broadcast %cst_13 : f32 to vector<128x128xf32>
    %28 = arith.maximumf %26, %27 : vector<128x128xf32>
    %29 = vector.shape_cast %28 : vector<128x128xf32> to vector<8x16x128xf32>
    %30 = tpu.iota {dimensions = array<i32: 2>} : vector<1x1x128xi32>
    %c0_i32 = arith.constant 0 : i32
    %31 = vector.broadcast %c0_i32 : i32 to vector<1x1x128xi32>
    %c0_i32_14 = arith.constant 0 : i32
    %32 = vector.broadcast %c0_i32_14 : i32 to vector<1x1x128xi32>
    %33 = arith.cmpi sge, %30, %32 : vector<1x1x128xi32>
    %c16_i32 = arith.constant 16 : i32
    %34 = vector.broadcast %c16_i32 : i32 to vector<1x1x128xi32>
    %35 = arith.cmpi slt, %30, %34 : vector<1x1x128xi32>
    %36 = arith.andi %33, %35 : vector<1x1x128xi1>
    %c14_i32 = arith.constant 14 : i32
    %37 = vector.broadcast %c14_i32 : i32 to vector<1x1x128xi32>
    %38 = arith.select %36, %37, %31 : vector<1x1x128xi1>, vector<1x1x128xi32>
    %c16_i32_15 = arith.constant 16 : i32
    %39 = vector.broadcast %c16_i32_15 : i32 to vector<1x1x128xi32>
    %40 = arith.cmpi sge, %30, %39 : vector<1x1x128xi32>
    %c32_i32 = arith.constant 32 : i32
    %41 = vector.broadcast %c32_i32 : i32 to vector<1x1x128xi32>
    %42 = arith.cmpi slt, %30, %41 : vector<1x1x128xi32>
    %43 = arith.andi %40, %42 : vector<1x1x128xi1>
    %c13_i32 = arith.constant 13 : i32
    %44 = vector.broadcast %c13_i32 : i32 to vector<1x1x128xi32>
    %45 = arith.select %43, %44, %38 : vector<1x1x128xi1>, vector<1x1x128xi32>
    %c32_i32_16 = arith.constant 32 : i32
    %46 = vector.broadcast %c32_i32_16 : i32 to vector<1x1x128xi32>
    %47 = arith.cmpi sge, %30, %46 : vector<1x1x128xi32>
    %c48_i32 = arith.constant 48 : i32
    %48 = vector.broadcast %c48_i32 : i32 to vector<1x1x128xi32>
    %49 = arith.cmpi slt, %30, %48 : vector<1x1x128xi32>
    %50 = arith.andi %47, %49 : vector<1x1x128xi1>
    %c12_i32 = arith.constant 12 : i32
    %51 = vector.broadcast %c12_i32 : i32 to vector<1x1x128xi32>
    %52 = arith.select %50, %51, %45 : vector<1x1x128xi1>, vector<1x1x128xi32>
    %53 = tpu.iota {dimensions = array<i32: 1>} : vector<8x16x128xi32>
    %54 = vector.broadcast %52 : vector<1x1x128xi32> to vector<8x16x128xi32>
    %55 = arith.cmpi sle, %53, %54 : vector<8x16x128xi32>
    %cst_17 = arith.constant 0.000000e+00 : f32
    %56 = vector.broadcast %cst_17 : f32 to vector<8x16x128xf32>
    %57 = arith.select %55, %29, %56 : vector<8x16x128xi1>, vector<8x16x128xf32>
    %cst_18 = arith.constant dense<0xFF800000> : vector<8x128xf32>
    %58 = vector.multi_reduction <maximumf>, %57, %cst_18 [1] : vector<8x16x128xf32> to vector<8x128xf32>
    %59 = arith.truncf %58 : vector<8x128xf32> to vector<8x128xbf16>
    %c0_19 = arith.constant 0 : index
    %c0_20 = arith.constant 0 : index
    %60 = vector.load %arg6[%c0_19, %c0_20] : memref<128x32xbf16, #tpu.memory_space<vmem>>, vector<128x32xbf16>
    %cst_21 = arith.constant dense<0.000000e+00> : vector<8x32xf32>
    %61 = tpu.matmul %59, %60, %cst_21 {dimension_numbers = #tpu.dot_dimension_numbers<[1], [0], [0], [1], [0, 0, 1, 1], [], []>} : vector<8x128xbf16>, vector<128x32xbf16>, vector<8x32xf32> -> vector<8x32xf32>
    %c0_22 = arith.constant 0 : index
    %c0_23 = arith.constant 0 : index
    %62 = vector.load %arg7[%c0_22, %c0_23] : memref<1x32xf32, #tpu.memory_space<vmem>>, vector<1x32xf32>
    %63 = vector.broadcast %62 : vector<1x32xf32> to vector<8x32xf32>
    %64 = arith.addf %61, %63 : vector<8x32xf32>
    %cst_24 = arith.constant 0.000000e+00 : f32
    %65 = vector.broadcast %cst_24 : f32 to vector<8x32xf32>
    %66 = arith.cmpf ogt, %64, %65 : vector<8x32xf32>
    %cst_25 = arith.constant 0.000000e+00 : f32
    %67 = vector.broadcast %cst_25 : f32 to vector<8x32xf32>
    %68 = arith.minimumf %64, %67 : vector<8x32xf32>
    %69 = math.exp %68 : vector<8x32xf32>
    %cst_26 = arith.constant 1.000000e+00 : f32
    %70 = vector.broadcast %cst_26 : f32 to vector<8x32xf32>
    %71 = arith.subf %69, %70 : vector<8x32xf32>
    %72 = arith.select %66, %64, %71 : vector<8x32xi1>, vector<8x32xf32>
    %73 = arith.truncf %72 : vector<8x32xf32> to vector<8x32xbf16>
    %c0_27 = arith.constant 0 : index
    %c0_28 = arith.constant 0 : index
    %74 = vector.load %arg8[%c0_27, %c0_28] : memref<32x128xbf16, #tpu.memory_space<vmem>>, vector<32x128xbf16>
    %cst_29 = arith.constant dense<0.000000e+00> : vector<8x128xf32>
    %75 = tpu.matmul %73, %74, %cst_29 {dimension_numbers = #tpu.dot_dimension_numbers<[1], [0], [0], [1], [0, 0, 1, 1], [], []>} : vector<8x32xbf16>, vector<32x128xbf16>, vector<8x128xf32> -> vector<8x128xf32>
    %c0_30 = arith.constant 0 : index
    %c0_31 = arith.constant 0 : index
    %76 = vector.load %arg9[%c0_30, %c0_31] : memref<1x128xf32, #tpu.memory_space<vmem>>, vector<1x128xf32>
    %77 = vector.broadcast %76 : vector<1x128xf32> to vector<8x128xf32>
    %78 = arith.addf %75, %77 : vector<8x128xf32>
    %c0_32 = arith.constant 0 : index
    %c0_33 = arith.constant 0 : index
    %79 = vector.load %arg10[%c0_32, %c0_33] : memref<8x128xf32, #tpu.memory_space<vmem>>, vector<8x128xf32>
    tpu.vector_store %arg10[%c0_32, %c0_33], %78 {strides = array<i32>} : memref<8x128xf32, #tpu.memory_space<vmem>>, vector<8x128xf32>,
    return
  }
  func.func @transform_0(%arg0: i32) -> (i32, i32) {
    %c0_i32 = arith.constant 0 : i32
    %c0_i32_0 = arith.constant 0 : i32
    return %arg0, %c0_i32 : i32, i32
  }
  func.func @transform_1(%arg0: i32) -> (i32, i32) {
    %c0_i32 = arith.constant 0 : i32
    %c0_i32_0 = arith.constant 0 : i32
    %c0_i32_1 = arith.constant 0 : i32
    return %c0_i32, %c0_i32_0 : i32, i32
  }
  func.func @transform_2(%arg0: i32) -> (i32, i32) {
    %c0_i32 = arith.constant 0 : i32
    %c0_i32_0 = arith.constant 0 : i32
    %c0_i32_1 = arith.constant 0 : i32
    return %c0_i32, %c0_i32_0 : i32, i32
  }
  func.func @transform_3(%arg0: i32) -> (i32, i32) {
    %c0_i32 = arith.constant 0 : i32
    %c0_i32_0 = arith.constant 0 : i32
    %c0_i32_1 = arith.constant 0 : i32
    return %c0_i32, %c0_i32_0 : i32, i32
  }
  func.func @transform_4(%arg0: i32) -> (i32, i32) {
    %c0_i32 = arith.constant 0 : i32
    %c0_i32_0 = arith.constant 0 : i32
    %c0_i32_1 = arith.constant 0 : i32
    return %c0_i32, %c0_i32_0 : i32, i32
  }
  func.func @transform_5(%arg0: i32) -> (i32, i32) {
    %c0_i32 = arith.constant 0 : i32
    %c0_i32_0 = arith.constant 0 : i32
    %c0_i32_1 = arith.constant 0 : i32
    return %c0_i32, %c0_i32_0 : i32, i32
  }
  func.func @transform_6(%arg0: i32) -> (i32, i32) {
    %c0_i32 = arith.constant 0 : i32
    %c0_i32_0 = arith.constant 0 : i32
    %c0_i32_1 = arith.constant 0 : i32
    return %c0_i32, %c0_i32_0 : i32, i32
  }
  func.func @transform_7(%arg0: i32) -> (i32, i32) {
    %c0_i32 = arith.constant 0 : i32
    %c0_i32_0 = arith.constant 0 : i32
    %c0_i32_1 = arith.constant 0 : i32
    return %c0_i32, %c0_i32_0 : i32, i32
  }
  func.func @transform_8(%arg0: i32) -> (i32, i32) {
    %c0_i32 = arith.constant 0 : i32
    %c0_i32_0 = arith.constant 0 : i32
    %c0_i32_1 = arith.constant 0 : i32
    return %c0_i32, %c0_i32_0 : i32, i32
  }
  func.func @transform_9(%arg0: i32) -> (i32, i32) {
    %c0_i32 = arith.constant 0 : i32
    %c0_i32_0 = arith.constant 0 : i32
    return %arg0, %c0_i32 : i32, i32
  }
}

</mosaic_0001>

<bundles_post_ra>
// kernel: tpu_custom_call.1
= control target key start
LH: loop header
LB: loop body
LE: loop exit
PB: predicated region body
PF: predicated region fallthrough
CT: control target
= control target key end

     0   :  { %s3420_s0 = inlined_call_operand.vmem [shape: bf16[128,768], index: 0, kind: input, shape index: {}]   ;;  %s3421_s1 = inlined_call_operand.vmem [shape: bf16[768,32], index: 1, kind: input, shape index: {}]   ;;  %s3422_s2 = inlined_call_operand.vmem [shape: f32[1,32], index: 2, kind: input, shape index: {}]   ;;  %s3423_s3 = inlined_call_operand.vmem [shape: bf16[128,128], index: 3, kind: input, shape index: {}]   ;;  %s3424_s4 = inlined_call_operand.vmem [shape: f32[1,128], index: 4, kind: input, shape index: {}]   ;;  %s3425_s5 = inlined_call_operand.vmem [shape: bf16[128,32], index: 5, kind: input, shape index: {}]   ;;  %s3426_s6 = inlined_call_operand.vmem [shape: f32[1,32], index: 6, kind: input, shape index: {}]   ;;  %s3427_s7 = inlined_call_operand.vmem [shape: bf16[32,128], index: 7, kind: input, shape index: {}]   ;;  %s3428_s8 = inlined_call_operand.vmem [shape: f32[1,128], index: 8, kind: input, shape index: {}]   ;;  %s3429_s9 = inlined_call_operand.hbm [shape: f32[8,128], index: 9, kind: output, shape index: {}]  }
   0x1   :  { %v2307_v0 = vld [vmem:[%s3421_s1 + $0x40] sm:$0xff]   ;;  %v2311_v4 = vld [vmem:[%s3421_s1 + $0x48] sm:$0xff]   ;;  %v2315_v8 = vld [vmem:[%s3421_s1 + $0x50] sm:$0xff]  }
   0x2   :  { %v2308_v1 = vld [vmem:[%s3421_s1] sm:$0xff]   ;;  %2020 = vmatprep.subr.bf16.mxu0 %v2307_v0  ;;  %v2312_v5 = vld [vmem:[%s3421_s1 + $0x8] sm:$0xff]   ;;  %v2316_v9 = vld [vmem:[%s3421_s1 + $0x10] sm:$0xff]  }
   0x3   :  { %v2309_v2 = vld [vmem:[%s3421_s1 + $0xc0] sm:$0xff]   ;;  %2021 = vmatpush3.bf16.msra.mxu0 %v2308_v1  ;;  %v2313_v6 = vld [vmem:[%s3421_s1 + $0xc8] sm:$0xff]   ;;  %v2317_v10 = vld [vmem:[%s3421_s1 + $0xd0] sm:$0xff]  }
   0x4   :  { %v2310_v3 = vld [vmem:[%s3421_s1 + $0x80] sm:$0xff]   ;;  %2084 = vmatprep.subr.bf16.mxu1 %v2309_v2  ;;  %2022 = vmatprep.subr.bf16.mxu0 %v2311_v4  ;;  %v2314_v7 = vld [vmem:[%s3421_s1 + $0x88] sm:$0xff]   ;;  %v2318_v11 = vld [vmem:[%s3421_s1 + $0x90] sm:$0xff]  }
   0x5   :  { %2085 = vmatpush3.bf16.msra.mxu1 %v2310_v3  ;;  %v2319_v12 = vld [vmem:[%s3421_s1 + $0x58] sm:$0xff]   ;;  %v2323_v16 = vld [vmem:[%s3421_s1 + $0x60] sm:$0xff]   ;;  %v2327_v20 = vld [vmem:[%s3421_s1 + $0x68] sm:$0xff]  }
   0x6   :  { %2086 = vmatprep.subr.bf16.mxu1 %v2313_v6  ;;  %v2320_v13 = vld [vmem:[%s3421_s1 + $0x18] sm:$0xff]   ;;  %v2324_v17 = vld [vmem:[%s3421_s1 + $0x20] sm:$0xff]   ;;  %v2328_v21 = vld [vmem:[%s3421_s1 + $0x28] sm:$0xff]  }
   0x7   :  { %2023 = vmatpush3.bf16.msra.mxu0 %v2312_v5  ;;  %v2321_v14 = vld [vmem:[%s3421_s1 + $0xd8] sm:$0xff]   ;;  %v2325_v18 = vld [vmem:[%s3421_s1 + $0xe0] sm:$0xff]   ;;  %v2329_v22 = vld [vmem:[%s3421_s1 + $0xe8] sm:$0xff]  }
   0x8   :  { %2024 = vmatprep.subr.bf16.mxu0 %v2315_v8  ;;  %v2322_v15 = vld [vmem:[%s3421_s1 + $0x98] sm:$0xff]   ;;  %v2326_v19 = vld [vmem:[%s3421_s1 + $0xa0] sm:$0xff]   ;;  %v2330_v23 = vld [vmem:[%s3421_s1 + $0xa8] sm:$0xff]  }
   0x9   :  { %2087 = vmatpush3.bf16.msra.mxu1 %v2314_v7  ;;  %v2331_v24 = vld [vmem:[%s3421_s1 + $0x70] sm:$0xff]   ;;  %v2335_v28 = vld [vmem:[%s3421_s1 + $0x78] sm:$0xff]   ;;  %v2342_v34 = vld [vmem:[%s3421_s1 + $0x140] sm:$0xff]  }
   0xa   :  { %2088 = vmatprep.subr.bf16.mxu1 %v2317_v10  ;;  %v2332_v25 = vld [vmem:[%s3421_s1 + $0x30] sm:$0xff]   ;;  %v2336_v29 = vld [vmem:[%s3421_s1 + $0x38] sm:$0xff]   ;;  %v2343_v35 = vld [vmem:[%s3420_s0 + $0x8] ss:$24 sps:$4 sm:$0xff]  }
   0xb   :  { %2025 = vmatpush3.bf16.msra.mxu0 %v2316_v9  ;;  %v2333_v26 = vld [vmem:[%s3421_s1 + $0xf0] sm:$0xff]   ;;  %v2337_v30 = vld [vmem:[%s3421_s1 + $0xf8] sm:$0xff]   ;;  %v2345_v36 = vld [vmem:[%s3420_s0 + $0xc] ss:$24 sps:$4 sm:$0xff]  }
   0xc   :  { %2026 = vmatprep.subr.bf16.mxu0 %v2319_v12  ;;  %v2334_v27 = vld [vmem:[%s3421_s1 + $0xb0] sm:$0xff]   ;;  %v2338_v31 = vld [vmem:[%s3420_s0] ss:$24 sps:$4 sm:$0xff]   ;;  %v2340_v32 = vld [vmem:[%s3420_s0 + $0x4] ss:$24 sps:$4 sm:$0xff]   ;;  %842 = vmatprep.mubr.bf16.mxu1 %v2345_v36 }
   0xd   :  { %2089 = vmatpush3.bf16.msra.mxu1 %v2318_v11  ;;  %v2341_v33 = vld [vmem:[%s3421_s1 + $0xb8] sm:$0xff]   ;;  %745 = vmatprep.mubr.bf16.mxu0 %v2340_v32  ;;  %v2346_v37 = vld [vmem:[%s3421_s1 + $0x100] sm:$0xff]   ;;  %v2347_v38 = vld [vmem:[%s3420_s0 + $0x34] ss:$24 sps:$4 sm:$0xff]  }
   0xe   :  { %2090 = vmatprep.subr.bf16.mxu1 %v2321_v14  ;;  %v2349_v39 = vld [vmem:[%s3420_s0 + $0x30] ss:$24 sps:$4 sm:$0xff]   ;;  %v2351_v41 = vld [vmem:[%s3420_s0 + $0x3c] ss:$24 sps:$4 sm:$0xff]   ;;  %v2359_v46 = vld [vmem:[%s3420_s0 + $0x6c] ss:$24 sps:$4 sm:$0xff]  }
   0xf   :  { %2027 = vmatpush3.bf16.msra.mxu0 %v2320_v13  ;;  %v2350_v40 = vld [vmem:[%s3421_s1 + $0x148] sm:$0xff]   ;;  %v2354_v43 = vld [vmem:[%s3420_s0 + $0x38] ss:$24 sps:$4 sm:$0xff]   ;;  %v2355_v44 = vld [vmem:[%s3420_s0 + $0x64] ss:$24 sps:$4 sm:$0xff]  }
  0x10   :  { %2028 = vmatprep.subr.bf16.mxu0 %v2323_v16  ;;  %v2353_v42 = vld [vmem:[%s3421_s1 + $0x108] sm:$0xff]   ;;  %v2358_v45 = vld [vmem:[%s3421_s1 + $0x150] sm:$0xff]   ;;  %v2357_v48 = vld [vmem:[%s3420_s0 + $0x60] ss:$24 sps:$4 sm:$0xff]  }
  0x11   :  { %2091 = vmatpush3.bf16.msra.mxu1 %v2322_v15  ;;  %v2361_v47 = vld [vmem:[%s3421_s1 + $0x110] sm:$0xff]   ;;  %v2366_v50 = vld [vmem:[%s3421_s1 + $0x158] sm:$0xff]   ;;  %v2362_v51 = vld [vmem:[%s3420_s0 + $0x68] ss:$24 sps:$4 sm:$0xff]  }
  0x12   :  { %2092 = vmatprep.subr.bf16.mxu1 %v2325_v18  ;;  %v2363_v49 = vld [vmem:[%s3420_s0 + $0x94] ss:$24 sps:$4 sm:$0xff]   ;;  %v2369_v52 = vld [vmem:[%s3421_s1 + $0x118] sm:$0xff]   ;;  %v2374_v54 = vld [vmem:[%s3421_s1 + $0x160] sm:$0xff]  }
  0x13   :  { %2029 = vmatpush3.bf16.msra.mxu0 %v2324_v17  ;;  %v2367_v53 = vld [vmem:[%s3420_s0 + $0x9c] ss:$24 sps:$4 sm:$0xff]   ;;  %v2377_v55 = vld [vmem:[%s3421_s1 + $0x120] sm:$0xff]   ;;  %v2365_v56 = vld [vmem:[%s3420_s0 + $0x90] ss:$24 sps:$4 sm:$0xff]  }
  0x14   :  { %2030 = vmatprep.subr.bf16.mxu0 %v2327_v20  ;;  %v2371_v57 = vld [vmem:[%s3420_s0 + $0xc4] ss:$24 sps:$4 sm:$0xff]   ;;  %v2382_v58 = vld [vmem:[%s3421_s1 + $0x168] sm:$0xff]   ;;  %v2370_v59 = vld [vmem:[%s3420_s0 + $0x98] ss:$24 sps:$4 sm:$0xff]  }
  0x15   :  { %2093 = vmatpush3.bf16.msra.mxu1 %v2326_v19  ;;  %v2375_v60 = vld [vmem:[%s3420_s0 + $0xcc] ss:$24 sps:$4 sm:$0xff]   ;;  %v2390_v62 = vld [vmem:[%s3421_s1 + $0x170] sm:$0xff]   ;;  %v2373_v63 = vld [vmem:[%s3420_s0 + $0xc0] ss:$24 sps:$4 sm:$0xff]  }
  0x16   :  { %2094 = vmatprep.subr.bf16.mxu1 %v2329_v22  ;;  %v2385_v61 = vld [vmem:[%s3421_s1 + $0x128] sm:$0xff]   ;;  %v2393_v1 = vld [vmem:[%s3421_s1 + $0x130] sm:$0xff]   ;;  %v2398_v3 = vld [vmem:[%s3421_s1 + $0x178] sm:$0xff]  }
  0x17   :  { %2031 = vmatpush3.bf16.msra.mxu0 %v2328_v21  ;;  %v2379_v0 = vld [vmem:[%s3420_s0 + $0xf4] ss:$24 sps:$4 sm:$0xff]   ;;  %v2378_v2 = vld [vmem:[%s3420_s0 + $0xc8] ss:$24 sps:$4 sm:$0xff]   ;;  %v2401_v5 = vld [vmem:[%s3421_s1 + $0x138] sm:$0xff]  }
  0x18   :  { %2032 = vmatprep.subr.bf16.mxu0 %v2331_v24  ;;  %v2383_v4 = vld [vmem:[%s3420_s0 + $0xfc] ss:$24 sps:$4 sm:$0xff]   ;;  %v2381_v6 = vld [vmem:[%s3420_s0 + $0xf0] ss:$24 sps:$4 sm:$0xff]   ;;  %v2391_v9 = vld [vmem:[%s3420_s0 + $0x12c] ss:$24 sps:$4 sm:$0xff]  }
  0x19   :  { %2095 = vmatpush3.bf16.msra.mxu1 %v2330_v23  ;;  %v2387_v7 = vld [vmem:[%s3420_s0 + $0x124] ss:$24 sps:$4 sm:$0xff]   ;;  %v2386_v8 = vld [vmem:[%s3420_s0 + $0xf8] ss:$24 sps:$4 sm:$0xff]   ;;  %v2395_v11 = vld [vmem:[%s3420_s0 + $0x154] ss:$24 sps:$4 sm:$0xff]  }
  0x1a   :  { %2096 = vmatprep.subr.bf16.mxu1 %v2333_v26  ;;  %v2389_v10 = vld [vmem:[%s3420_s0 + $0x120] ss:$24 sps:$4 sm:$0xff]   ;;  %v2399_v13 = vld [vmem:[%s3420_s0 + $0x15c] ss:$24 sps:$4 sm:$0xff]   ;;  %v2397_v14 = vld [vmem:[%s3420_s0 + $0x150] ss:$24 sps:$4 sm:$0xff]  }
  0x1b   :  { %2033 = vmatpush3.bf16.msra.mxu0 %v2332_v25  ;;  %v2394_v12 = vld [vmem:[%s3420_s0 + $0x128] ss:$24 sps:$4 sm:$0xff]   ;;  %v2405_v15 = vld [vmem:[%s3420_s0 + $0x14] ss:$24 sps:$4 sm:$0xff]   ;;  %v2402_v16 = vld [vmem:[%s3420_s0 + $0x158] ss:$24 sps:$4 sm:$0xff]  }
  0x1c   :  { %2034 = vmatprep.subr.bf16.mxu0 %v2335_v28 }
  0x1d   :  { %2097 = vmatpush3.bf16.msra.mxu1 %v2334_v27 }
  0x1e   :  { %2098 = vmatprep.subr.bf16.mxu1 %v2337_v30 }
  0x1f   :  { %2035 = vmatpush3.bf16.msra.mxu0 %v2336_v29 }
  0x20   :  { %2148 = vmatprep.subr.bf16.mxu0 %v2342_v34 }
  0x21   :  { %2099 = vmatpush3.bf16.msra.mxu1 %v2341_v33 }
  0x22   :  { %746 = vmatmul.mubr.bf16.vlgmr.msra.gmra.mrb[0].mxu0 %v2338_v31 }
  0x23   :  { %2149 = vmatpush3.bf16.msra.mxu0 %v2346_v37  ;;  %753 = vmatprep.mubr.bf16.mxu0 %v2347_v38 }
  0x24   :  { %843 = vmatmul.mubr.bf16.vlgmr.msra.gmra.mrb[0].mxu1 %v2343_v35  ;;  %2150 = vmatprep.subr.bf16.mxu0 %v2350_v40 }
  0x25   :  { %850 = vmatprep.mubr.bf16.mxu1 %v2351_v41 }
  0x27   :  { %2151 = vmatpush3.bf16.msra.mxu0 %v2353_v42 }
  0x28   :  { %2152 = vmatprep.subr.bf16.mxu0 %v2358_v45 }
  0x2a   :  { %754 = vmatmul.mubr.bf16.gmra.mrb[4].mxu0 %v2349_v39 }
  0x2b   :  { %761 = vmatprep.mubr.bf16.mxu0 %v2355_v44  ;;  %2153 = vmatpush3.bf16.msra.mxu0 %v2361_v47 }
  0x2c   :  { %851 = vmatmul.mubr.bf16.gmra.mrb[4].mxu1 %v2354_v43  ;;  %2154 = vmatprep.subr.bf16.mxu0 %v2366_v50 }
  0x2d   :  { %858 = vmatprep.mubr.bf16.mxu1 %v2359_v46 }
  0x2f   :  { %2155 = vmatpush3.bf16.msra.mxu0 %v2369_v52 }
  0x30   :  { %2156 = vmatprep.subr.bf16.mxu0 %v2374_v54 }
  0x32   :  { %762 = vmatmul.mubr.bf16.gmra.mrb[8].mxu0 %v2357_v48 }
  0x33   :  { %769 = vmatprep.mubr.bf16.mxu0 %v2363_v49  ;;  %2157 = vmatpush3.bf16.msra.mxu0 %v2377_v55 }
  0x34   :  { %859 = vmatmul.mubr.bf16.gmra.mrb[8].mxu1 %v2362_v51  ;;  %2158 = vmatprep.subr.bf16.mxu0 %v2382_v58 }
  0x35   :  { %866 = vmatprep.mubr.bf16.mxu1 %v2367_v53 }
  0x37   :  { %2159 = vmatpush3.bf16.msra.mxu0 %v2385_v61 }
  0x38   :  { %2160 = vmatprep.subr.bf16.mxu0 %v2390_v62 }
  0x3a   :  { %770 = vmatmul.mubr.bf16.gmra.mrb[12].mxu0 %v2365_v56 }
  0x3b   :  { %777 = vmatprep.mubr.bf16.mxu0 %v2371_v57  ;;  %2161 = vmatpush3.bf16.msra.mxu0 %v2393_v1 }
  0x3c   :  { %867 = vmatmul.mubr.bf16.gmra.mrb[12].mxu1 %v2370_v59  ;;  %2162 = vmatprep.subr.bf16.mxu0 %v2398_v3 }
  0x3d   :  { %874 = vmatprep.mubr.bf16.mxu1 %v2375_v60 }
  0x3f   :  { %2163 = vmatpush3.bf16.msra.mxu0 %v2401_v5 }
  0x42   :  { %778 = vmatmul.mubr.bf16.gmra.mrb[16].mxu0 %v2373_v63 }
  0x43   :  { %785 = vmatprep.mubr.bf16.mxu0 %v2379_v0 }
  0x44   :  { %875 = vmatmul.mubr.bf16.gmra.mrb[16].mxu1 %v2378_v2 }
  0x45   :  { %882 = vmatprep.mubr.bf16.mxu1 %v2383_v4 }
  0x4a   :  { %786 = vmatmul.mubr.bf16.gmra.mrb[20].mxu0 %v2381_v6 }
  0x4b   :  { %793 = vmatprep.mubr.bf16.mxu0 %v2387_v7 }
  0x4c   :  { %883 = vmatmul.mubr.bf16.gmra.mrb[20].mxu1 %v2386_v8 }
  0x4d   :  { %890 = vmatprep.mubr.bf16.mxu1 %v2391_v9 }
  0x52   :  { %794 = vmatmul.mubr.bf16.gmra.mrb[24].mxu0 %v2389_v10 }
  0x53   :  { %801 = vmatprep.mubr.bf16.mxu0 %v2395_v11 }
  0x54   :  { %891 = vmatmul.mubr.bf16.gmra.mrb[24].mxu1 %v2394_v12 }
  0x55   :  { %898 = vmatprep.mubr.bf16.mxu1 %v2399_v13 }
  0x5a   :  { %802 = vmatmul.mubr.bf16.gmra.mrb[28].mxu0 %v2397_v14 }
  0x5b   :  { %939 = vmatprep.mubr.bf16.mxu0 %v2405_v15 }
  0x5c   :  { %14 = vsyncpa [#allocation3], 0  ;;  %899 = vmatmul.mubr.bf16.gmra.mrb[28].mxu1 %v2402_v16  ;;  %v2403_v17 = vld [vmem:[%s3420_s0 + $0x10] ss:$24 sps:$4 sm:$0xff]   ;;  %v2406_v18 = vld [vmem:[%s3420_s0 + $0x44] ss:$24 sps:$4 sm:$0xff]  }
  0x5d   :  { %v2408_v19 = vld [vmem:[%s3420_s0 + $0x40] ss:$24 sps:$4 sm:$0xff]   ;;  %v2409_v20 = vld [vmem:[%s3420_s0 + $0x74] ss:$24 sps:$4 sm:$0xff]   ;;  %v2411_v21 = vld [vmem:[%s3420_s0 + $0x70] ss:$24 sps:$4 sm:$0xff]  }
  0x5e   :  { %v2412_v22 = vld [vmem:[%s3420_s0 + $0xa4] ss:$24 sps:$4 sm:$0xff]   ;;  %v2414_v23 = vld [vmem:[%s3420_s0 + $0xa0] ss:$24 sps:$4 sm:$0xff]   ;;  %v2415_v24 = vld [vmem:[%s3420_s0 + $0xd4] ss:$24 sps:$4 sm:$0xff]  }
  0x5f   :  { %v2417_v25 = vld [vmem:[%s3420_s0 + $0xd0] ss:$24 sps:$4 sm:$0xff]   ;;  %v2418_v26 = vld [vmem:[%s3420_s0 + $0x104] ss:$24 sps:$4 sm:$0xff]   ;;  %v2420_v27 = vld [vmem:[%s3420_s0 + $0x100] ss:$24 sps:$4 sm:$0xff]  }
  0x60   :  { %v2421_v28 = vld [vmem:[%s3420_s0 + $0x134] ss:$24 sps:$4 sm:$0xff]   ;;  %v2423_v29 = vld [vmem:[%s3420_s0 + $0x130] ss:$24 sps:$4 sm:$0xff]   ;;  %v2424_v30 = vld [vmem:[%s3420_s0 + $0x164] ss:$24 sps:$4 sm:$0xff]  }
  0x61   :  { %v2426_v31 = vld [vmem:[%s3420_s0 + $0x160] ss:$24 sps:$4 sm:$0xff]   ;;  %s2504_s25 = smov 32   ;;  %s2505_s26 = smov 96  }
  0x62   :  { %940 = vmatmul.mubr.bf16.vlgmr.msra.gmra.mrb[32].mxu0 %v2403_v17  ;;  %v2851_v33 = vld [vmem:[%s3422_s2] ss:$0 sm:$0xff] }
  0x63   :  { %947 = vmatprep.mubr.bf16.mxu0 %v2406_v18 }
  0x6a   :  { %948 = vmatmul.mubr.bf16.gmra.mrb[36].mxu0 %v2408_v19 }
  0x6b   :  { %955 = vmatprep.mubr.bf16.mxu0 %v2409_v20 }
  0x72   :  { %956 = vmatmul.mubr.bf16.gmra.mrb[40].mxu0 %v2411_v21 }
  0x73   :  { %963 = vmatprep.mubr.bf16.mxu0 %v2412_v22 }
  0x7a   :  { %964 = vmatmul.mubr.bf16.gmra.mrb[44].mxu0 %v2414_v23 }
  0x7b   :  { %971 = vmatprep.mubr.bf16.mxu0 %v2415_v24 }
  0x82   :  { %972 = vmatmul.mubr.bf16.gmra.mrb[48].mxu0 %v2417_v25 }
  0x83   :  { %979 = vmatprep.mubr.bf16.mxu0 %v2418_v26 }
  0x8a   :  { %980 = vmatmul.mubr.bf16.gmra.mrb[52].mxu0 %v2420_v27 }
  0x8b   :  { %987 = vmatprep.mubr.bf16.mxu0 %v2421_v28 }
  0x92   :  { %988 = vmatmul.mubr.bf16.gmra.mrb[56].mxu0 %v2423_v29 }
  0x93   :  { %995 = vmatprep.mubr.bf16.mxu0 %v2424_v30 }
  0x9a   :  { %996 = vmatmul.mubr.bf16.gmra.mrb[60].mxu0 %v2426_v31 }
  0xf5   :  { %v2036_v32 = vpop.f32.mrb[0].mxu0 }
  0xf6   :  { %v2037_v34 = vpop.f32.mrb[1].mxu0 }
  0xf7   :  { %v2038_v35 = vadd.f32 %v2037_v34, %v2036_v32  ;;  %v2039_v36 = vpop.f32.mrb[2].mxu0  ;;  %v2100_v37 = vpop.f32.mrb[0].mxu1 }
  0xf8   :  { %v2040_v38 = vpop.f32.mrb[3].mxu0  ;;  %v2101_v41 = vpop.f32.mrb[1].mxu1 }
  0xf9   :  { %v748_v39 = vadd.f32 %v2038_v35, %v2851_v33  ;;  %v2041_v40 = vadd.f32 %v2040_v38, %v2039_v36  ;;  %v2102_v42 = vadd.f32 %v2101_v41, %v2100_v37  ;;  %v2103_v43 = vpop.f32.mrb[2].mxu1  ;;  %v2427_v36 = vld [vmem:[%s3423_s3] sm:$0xff]   ;;  %v2428_v37 = vld [vmem:[%s3423_s3 + $0x8] sm:$0xff]  }
  0xfa   :  { %v2104_v45 = vpop.f32.mrb[3].mxu1  ;;  %2240 = vmatprep.subr.bf16.mxu1 %v2427_v36 }
  0xfb   :  { %v751_v44 = vadd.f32 %v2041_v40, %v2851_v33  ;;  %v2855_v46 = vadd.f32 %v2102_v42, %v748_v39  ;;  %v2105_v47 = vadd.f32 %v2104_v45, %v2103_v43  ;;  %2241 = vmatpush3.bf16.msra.mxu1 %v2427_v36 }
  0xfc   :  { %2242 = vmatprep.subr.bf16.mxu1 %v2428_v37 }
  0xfd   :  { %v2042_v48 = vpop.f32.mrb[4].mxu0  ;;  %v2857_v49 = vadd.f32 %v2105_v47, %v751_v44 }
  0xfe   :  { %v2043_v50 = vpop.f32.mrb[5].mxu0 }
  0xff   :  { %v2044_v51 = vadd.f32 %v2043_v50, %v2042_v48  ;;  %v2045_v52 = vpop.f32.mrb[6].mxu0  ;;  %v2106_v53 = vpop.f32.mrb[4].mxu1  ;;  %v2429_v48 = vld [vmem:[%s3423_s3 + $0x10] sm:$0xff]   ;;  %2243 = vmatpush3.bf16.msra.mxu1 %v2428_v37 }
 0x100   :  { %v2046_v54 = vpop.f32.mrb[7].mxu0  ;;  %v2107_v57 = vpop.f32.mrb[5].mxu1  ;;  %2244 = vmatprep.subr.bf16.mxu1 %v2429_v48 }
 0x101   :  { %v756_v55 = vadd.f32 %v2044_v51, %v2851_v33  ;;  %v2047_v56 = vadd.f32 %v2046_v54, %v2045_v52  ;;  %v2108_v58 = vadd.f32 %v2107_v57, %v2106_v53  ;;  %v2109_v59 = vpop.f32.mrb[6].mxu1  ;;  %v2430_v57 = vld [vmem:[%s3423_s3 + $0x18] sm:$0xff]  }
 0x102   :  { %v2110_v61 = vpop.f32.mrb[7].mxu1 }
 0x103   :  { %v759_v60 = vadd.f32 %v2047_v56, %v2851_v33  ;;  %v2861_v62 = vadd.f32 %v2108_v58, %v756_v55  ;;  %v2111_v63 = vadd.f32 %v2110_v61, %v2109_v59  ;;  %2245 = vmatpush3.bf16.msra.mxu1 %v2429_v48 }
 0x104   :  { %2246 = vmatprep.subr.bf16.mxu1 %v2430_v57 }
 0x105   :  { %v2048_v0 = vpop.f32.mrb[8].mxu0  ;;  %v2863_v1 = vadd.f32 %v2111_v63, %v759_v60 }
 0x106   :  { %v2049_v2 = vpop.f32.mrb[9].mxu0 }
 0x107   :  { %v2050_v3 = vadd.f32 %v2049_v2, %v2048_v0  ;;  %v2051_v4 = vpop.f32.mrb[10].mxu0  ;;  %v2112_v5 = vpop.f32.mrb[8].mxu1  ;;  %2247 = vmatpush3.bf16.msra.mxu1 %v2430_v57 }
 0x108   :  { %v2052_v6 = vpop.f32.mrb[11].mxu0  ;;  %v2113_v9 = vpop.f32.mrb[9].mxu1 }
 0x109   :  { %v764_v7 = vadd.f32 %v2050_v3, %v2851_v33  ;;  %v2053_v8 = vadd.f32 %v2052_v6, %v2051_v4  ;;  %v2114_v10 = vadd.f32 %v2113_v9, %v2112_v5  ;;  %v2115_v11 = vpop.f32.mrb[10].mxu1  ;;  %v2431_v5 = vld [vmem:[%s3423_s3 + $0x20] sm:$0xff]  }
 0x10a   :  { %v2116_v13 = vpop.f32.mrb[11].mxu1  ;;  %2248 = vmatprep.subr.bf16.mxu1 %v2431_v5 }
 0x10b   :  { %v767_v12 = vadd.f32 %v2053_v8, %v2851_v33  ;;  %v2867_v14 = vadd.f32 %v2114_v10, %v764_v7  ;;  %v2117_v15 = vadd.f32 %v2116_v13, %v2115_v11  ;;  %2249 = vmatpush3.bf16.msra.mxu1 %v2431_v5 }
 0x10d   :  { %v2054_v16 = vpop.f32.mrb[12].mxu0  ;;  %v2869_v17 = vadd.f32 %v2117_v15, %v767_v12 }
 0x10e   :  { %v2055_v18 = vpop.f32.mrb[13].mxu0 }
 0x10f   :  { %v2056_v19 = vadd.f32 %v2055_v18, %v2054_v16  ;;  %v2057_v20 = vpop.f32.mrb[14].mxu0  ;;  %v2118_v21 = vpop.f32.mrb[12].mxu1 }
 0x110   :  { %v2058_v22 = vpop.f32.mrb[15].mxu0  ;;  %v2119_v25 = vpop.f32.mrb[13].mxu1 }
 0x111   :  { %v772_v23 = vadd.f32 %v2056_v19, %v2851_v33  ;;  %v2059_v24 = vadd.f32 %v2058_v22, %v2057_v20  ;;  %v2120_v26 = vadd.f32 %v2119_v25, %v2118_v21  ;;  %v2121_v27 = vpop.f32.mrb[14].mxu1 }
 0x112   :  { %v2122_v29 = vpop.f32.mrb[15].mxu1 }
 0x113   :  { %v775_v28 = vadd.f32 %v2059_v24, %v2851_v33  ;;  %v2873_v30 = vadd.f32 %v2120_v26, %v772_v23  ;;  %v2123_v31 = vadd.f32 %v2122_v29, %v2121_v27 }
 0x115   :  { %v2060_v32 = vpop.f32.mrb[16].mxu0  ;;  %v2875_v34 = vadd.f32 %v2123_v31, %v775_v28 }
 0x116   :  { %v2061_v35 = vpop.f32.mrb[17].mxu0 }
 0x117   :  { %v2062_v38 = vadd.f32 %v2061_v35, %v2060_v32  ;;  %v2063_v39 = vpop.f32.mrb[18].mxu0  ;;  %v2124_v40 = vpop.f32.mrb[16].mxu1 }
 0x118   :  { %v2064_v41 = vpop.f32.mrb[19].mxu0  ;;  %v2125_v44 = vpop.f32.mrb[17].mxu1 }
 0x119   :  { %v780_v42 = vadd.f32 %v2062_v38, %v2851_v33  ;;  %v2065_v43 = vadd.f32 %v2064_v41, %v2063_v39  ;;  %v2126_v45 = vadd.f32 %v2125_v44, %v2124_v40  ;;  %v2127_v47 = vpop.f32.mrb[18].mxu1 }
 0x11a   :  { %v2128_v51 = vpop.f32.mrb[19].mxu1 }
 0x11b   :  { %v783_v50 = vadd.f32 %v2065_v43, %v2851_v33  ;;  %v2888_v52 = vadd.f32 %v2126_v45, %v780_v42  ;;  %v2129_v53 = vadd.f32 %v2128_v51, %v2127_v47 }
 0x11d   :  { %v2066_v54 = vpop.f32.mrb[20].mxu0  ;;  %v2890_v55 = vadd.f32 %v2129_v53, %v783_v50 }
 0x11e   :  { %v2067_v56 = vpop.f32.mrb[21].mxu0 }
 0x11f   :  { %v2068_v58 = vadd.f32 %v2067_v56, %v2066_v54  ;;  %v2069_v59 = vpop.f32.mrb[22].mxu0  ;;  %v2130_v60 = vpop.f32.mrb[20].mxu1 }
 0x120   :  { %v2070_v61 = vpop.f32.mrb[23].mxu0  ;;  %v2131_v2 = vpop.f32.mrb[21].mxu1 }
 0x121   :  { %v788_v63 = vadd.f32 %v2068_v58, %v2851_v33  ;;  %v2071_v0 = vadd.f32 %v2070_v61, %v2069_v59  ;;  %v2132_v3 = vadd.f32 %v2131_v2, %v2130_v60  ;;  %v2133_v4 = vpop.f32.mrb[22].mxu1 }
 0x122   :  { %v2134_v7 = vpop.f32.mrb[23].mxu1 }
 0x123   :  { %v791_v6 = vadd.f32 %v2071_v0, %v2851_v33  ;;  %v2900_v8 = vadd.f32 %v2132_v3, %v788_v63  ;;  %v2135_v9 = vadd.f32 %v2134_v7, %v2133_v4 }
 0x125   :  { %v2072_v10 = vpop.f32.mrb[24].mxu0  ;;  %v2902_v11 = vadd.f32 %v2135_v9, %v791_v6 }
 0x126   :  { %v2073_v12 = vpop.f32.mrb[25].mxu0 }
 0x127   :  { %v2074_v13 = vadd.f32 %v2073_v12, %v2072_v10  ;;  %v2075_v15 = vpop.f32.mrb[26].mxu0  ;;  %v2136_v16 = vpop.f32.mrb[24].mxu1 }
 0x128   :  { %v2076_v18 = vpop.f32.mrb[27].mxu0  ;;  %v2137_v21 = vpop.f32.mrb[25].mxu1 }
 0x129   :  { %v796_v19 = vadd.f32 %v2074_v13, %v2851_v33  ;;  %v2077_v20 = vadd.f32 %v2076_v18, %v2075_v15  ;;  %v2138_v22 = vadd.f32 %v2137_v21, %v2136_v16  ;;  %v2139_v23 = vpop.f32.mrb[26].mxu1 }
 0x12a   :  { %v2140_v25 = vpop.f32.mrb[27].mxu1 }
 0x12b   :  { %v799_v24 = vadd.f32 %v2077_v20, %v2851_v33  ;;  %v2906_v26 = vadd.f32 %v2138_v22, %v796_v19  ;;  %v2141_v27 = vadd.f32 %v2140_v25, %v2139_v23 }
 0x12d   :  { %v2078_v28 = vpop.f32.mrb[28].mxu0  ;;  %v2908_v29 = vadd.f32 %v2141_v27, %v799_v24 }
 0x12e   :  { %v2079_v31 = vpop.f32.mrb[29].mxu0 }
 0x12f   :  { %v2080_v32 = vadd.f32 %v2079_v31, %v2078_v28  ;;  %v2081_v35 = vpop.f32.mrb[30].mxu0  ;;  %v2142_v36 = vpop.f32.mrb[28].mxu1 }
 0x130   :  { %v2082_v37 = vpop.f32.mrb[31].mxu0  ;;  %v2143_v40 = vpop.f32.mrb[29].mxu1 }
 0x131   :  { %v804_v38 = vadd.f32 %v2080_v32, %v2851_v33  ;;  %v2083_v39 = vadd.f32 %v2082_v37, %v2081_v35  ;;  %v2144_v41 = vadd.f32 %v2143_v40, %v2142_v36  ;;  %v2145_v42 = vpop.f32.mrb[30].mxu1 }
 0x132   :  { %v2146_v44 = vpop.f32.mrb[31].mxu1 }
 0x133   :  { %v807_v43 = vadd.f32 %v2083_v39, %v2851_v33  ;;  %v2912_v45 = vadd.f32 %v2144_v41, %v804_v38  ;;  %v2147_v47 = vadd.f32 %v2146_v44, %v2145_v42  ;;  %v2432_v39 = vld [vmem:[%s3423_s3 + $0x28] sm:$0xff]  }
 0x134   :  { %2250 = vmatprep.subr.bf16.mxu1 %v2432_v39 }
 0x135   :  { %v2164_v48 = vpop.f32.mrb[32].mxu0  ;;  %v2914_v50 = vadd.f32 %v2147_v47, %v807_v43  ;;  %2251 = vmatpush3.bf16.msra.mxu1 %v2432_v39 }
 0x136   :  { %v2165_v51 = vpop.f32.mrb[33].mxu0 }
 0x137   :  { %v2166_v53 = vadd.f32 %v2165_v51, %v2164_v48  ;;  %v2167_v54 = vpop.f32.mrb[34].mxu0 }
 0x138   :  { %v2168_v56 = vpop.f32.mrb[35].mxu0 }
 0x139   :  { %v942_v57 = vadd.f32 %v2166_v53, %v2855_v46  ;;  %v2169_v58 = vadd.f32 %v2168_v56, %v2167_v54 }
 0x13b   :  { %v1020_v59 = vmin.f32 %v942_v57, 0.0  ;;  %v945_v60 = vadd.f32 %v2169_v58, %v2857_v49  ;;  %v1124_v49 = vlaneseq  ;;  %vm1004_vm0 = vcmp.gt.f32.partialorder %v942_v57, 0.0 }
 0x13d   :  { %v1036_v61 = vmul.f32 1.442695, %v1020_v59  ;;  %v1021_v63 = vmin.f32 %v945_v60, 0.0  ;;  %v2170_v33 = vpop.f32.mrb[36].mxu0  ;;  %vm1005_vm2 = vcmp.gt.f32.partialorder %v945_v60, 0.0  ;;  %v2433_v59 = vld [vmem:[%s3423_s3 + $0x30] sm:$0xff]  }
 0x13e   :  { %v2171_v0 = vpop.f32.mrb[37].mxu0  ;;  %2252 = vmatprep.subr.bf16.mxu1 %v2433_v59 }
 0x13f   :  { %2445 = vpow2.f32 %v1036_v61  ;;  %v1038_v2 = vmul.f32 1.442695, %v1021_v63  ;;  %v2172_v3 = vadd.f32 %v2171_v0, %v2170_v33  ;;  %v2173_v4 = vpop.f32.mrb[38].mxu0  ;;  %2253 = vmatpush3.bf16.msra.mxu1 %v2433_v59 }
 0x140   :  { %v2174_v5 = vpop.f32.mrb[39].mxu0 }
 0x141   :  { %2447 = vpow2.f32 %v1038_v2  ;;  %v2919_v6 = vadd.f32 %v2172_v3, %v2861_v62  ;;  %v2175_v7 = vadd.f32 %v2174_v5, %v2173_v4  ;;  %v2927_v62 = vshrl.u32 %v1124_v49, 7 }
 0x143   :  { %v1022_v46 = vmin.f32 %v2919_v6, 0.0  ;;  %v2923_v9 = vadd.f32 %v2175_v7, %v2863_v1  ;;  %vm1167_vm1 = vcmp.lt.s32.totalorder %v2927_v62, 6  ;;  %vm1126_vm3 = vcmp.lt.s32.totalorder %v2927_v62, 7 }
 0x144   :  { %vm1208_vm4 = vcmp.lt.s32.totalorder %v2927_v62, 5  ;;  %vm1006_vm5 = vcmp.gt.f32.partialorder %v2919_v6, 0.0 }
 0x145   :  { %v1040_v10 = vmul.f32 1.442695, %v1022_v46  ;;  %v1023_v12 = vmin.f32 %v2923_v9, 0.0  ;;  %v2176_v13 = vpop.f32.mrb[40].mxu0  ;;  %vm1007_vm6 = vcmp.gt.f32.partialorder %v2923_v9, 0.0 }
 0x146   :  { %v2177_v15 = vpop.f32.mrb[41].mxu0 }
 0x147   :  { %2449 = vpow2.f32 %v1040_v10  ;;  %v1042_v16 = vmul.f32 1.442695, %v1023_v12  ;;  %v2178_v18 = vadd.f32 %v2177_v15, %v2176_v13  ;;  %v2179_v19 = vpop.f32.mrb[42].mxu0 }
 0x148   :  { %v2180_v20 = vpop.f32.mrb[43].mxu0 }
 0x149   :  { %v2446_v21 = vpop.eup %2445  ;;  %2451 = vpow2.f32 %v1042_v16  ;;  %v2930_v22 = vadd.f32 %v2178_v18, %v2867_v14  ;;  %v2181_v1 = vadd.f32 %v2180_v20, %v2179_v19 }
 0x14a   :  { %v1981_v23 = vadd.f32 -1.0, %v2446_v21 }
 0x14b   :  { %v2448_v24 = vpop.eup %2447  ;;  %v1024_v25 = vmin.f32 %v2930_v22, 0.0  ;;  %v2934_v27 = vadd.f32 %v2181_v1, %v2869_v17  ;;  %vm1008_vm7 = vcmp.gt.f32.partialorder %v2930_v22, 0.0 }
 0x14c   :  { %v2936_v28 = vsel %vm1004_vm0, %v942_v57, %v1981_v23  ;;  %v1982_v31 = vadd.f32 -1.0, %v2448_v24 }
 0x14d   :  { %v1044_v32 = vmul.f32 1.442695, %v1024_v25  ;;  %v1025_v35 = vmin.f32 %v2934_v27, 0.0  ;;  %v2182_v14 = vpop.f32.mrb[44].mxu0  ;;  %v1151_v38 = vrot.slane %v2936_v28, 2  ;;  %v1108_v17 = vrot.slane %v2936_v28, 1 }
 0x14e   :  { %v2941_v36 = vsel %vm1005_vm2, %v945_v60, %v1982_v31  ;;  %v2183_v37 = vpop.f32.mrb[45].mxu0  ;;  %v1192_v48 = vrot.slane %v2936_v28, 3  ;;  %vm1009_vm8 = vcmp.gt.f32.partialorder %v2934_v27, 0.0 }
 0x14f   :  { %2453 = vpow2.f32 %v1044_v32  ;;  %v1046_v40 = vmul.f32 1.442695, %v1025_v35  ;;  %v2184_v41 = vadd.f32 %v2183_v37, %v2182_v14  ;;  %v2185_v42 = vpop.f32.mrb[46].mxu0  ;;  %v1152_v43 = vrot.slane %v2941_v36, 2 }
 0x150   :  { %v2186_v44 = vpop.f32.mrb[47].mxu0  ;;  %v1109_v47 = vrot.slane %v2941_v36, 1  ;;  %v1193_v51 = vrot.slane %v2941_v36, 3  ;;  %v1100_v53 = vpack.c.bf16 %v2941_v36, %v2936_v28 }
 0x151   :  { %v2450_v54 = vpop.eup %2449  ;;  %2455 = vpow2.f32 %v1046_v40  ;;  %v2956_v56 = vadd.f32 %v2184_v41, %v2873_v30  ;;  %v2187_v57 = vadd.f32 %v2186_v44, %v2185_v42  ;;  %v1182_v58 = vsel %vm1167_vm1, %v1151_v38, %v1152_v43 }
 0x152   :  { %v1983_v60 = vadd.f32 -1.0, %v2450_v54  ;;  %v1141_v61 = vsel %vm1126_vm3, %v1108_v17, %v1109_v47  ;;  %v2973_v30 = vsel %vm1208_vm4, %v1192_v48, %v1193_v51 }
 0x153   :  { %v2452_v63 = vpop.eup %2451  ;;  %v1026_v33 = vmin.f32 %v2956_v56, 0.0  ;;  %v2978_v0 = vadd.f32 %v2187_v57, %v2875_v34  ;;  %vm1010_vm9 = vcmp.gt.f32.partialorder %v2956_v56, 0.0 }
 0x154   :  { %v2981_v2 = vsel %vm1006_vm5, %v2919_v6, %v1983_v60  ;;  %v1984_v3 = vadd.f32 -1.0, %v2452_v63  ;;  %v2434_v6 = vld [vmem:[%s3423_s3 + $0x38] sm:$0xff]   ;;  %s2503_s3 = smov 64  }
 0x155   :  { %v1048_v4 = vmul.f32 1.442695, %v1026_v33  ;;  %v1027_v5 = vmin.f32 %v2978_v0, 0.0  ;;  %v2188_v7 = vpop.f32.mrb[48].mxu0  ;;  %v1153_v46 = vrot.slane %v2981_v2, 2  ;;  %v1110_v34 = vrot.slane %v2981_v2, 1  ;;  %2254 = vmatprep.subr.bf16.mxu1 %v2434_v6 }
 0x156   :  { %v2987_v10 = vsel %vm1007_vm6, %v2923_v9, %v1984_v3  ;;  %v2189_v12 = vpop.f32.mrb[49].mxu0  ;;  %v1194_v13 = vrot.slane %v2981_v2, 3  ;;  %2255 = vmatpush3.bf16.msra.mxu1 %v2434_v6  ;;  %vm1011_vm10 = vcmp.gt.f32.partialorder %v2978_v0, 0.0  ;;  %vm2507_vm6 = vmmov 0  }
 0x157   :  { %2457 = vpow2.f32 %v1048_v4  ;;  %v1050_v15 = vmul.f32 1.442695, %v1027_v5  ;;  %v2190_v16 = vadd.f32 %v2189_v12, %v2188_v7  ;;  %v2191_v18 = vpop.f32.mrb[50].mxu0  ;;  %v1181_v19 = vsel %vm1167_vm1, %v1152_v43, %v1153_v46 }
 0x158   :  { %v2192_v20 = vpop.f32.mrb[51].mxu0  ;;  %v1184_v21 = vpack.c.bf16 %v1181_v19, %v1182_v58  ;;  %v1140_v9 = vsel %vm1126_vm3, %v1109_v47, %v1110_v34  ;;  %v1222_v1 = vsel %vm1208_vm4, %v1193_v51, %v1194_v13  ;;  %v1154_v23 = vrot.slane %v2987_v10, 2 }
 0x159   :  { %v2454_v24 = vpop.eup %2453  ;;  %2459 = vpow2.f32 %v1050_v15  ;;  %v3002_v25 = vadd.f32 %v2190_v16, %v2888_v52  ;;  %v2193_v31 = vadd.f32 %v2192_v20, %v2191_v18  ;;  %v1143_v32 = vpack.c.bf16 %v1140_v9, %v1141_v61 }
 0x15a   :  { %v1985_v35 = vadd.f32 -1.0, %v2454_v24  ;;  %1265 = vrot.lane.b32.xlu1 %v1184_v21, %s2503_s3  ;;  %v1225_v14 = vpack.c.bf16 %v1222_v1, %v2973_v30  ;;  %v1180_v37 = vsel %vm1167_vm1, %v1153_v46, %v1154_v23  ;;  %v1111_v39 = vrot.slane %v2987_v10, 1 }
 0x15b   :  { %v2456_v40 = vpop.eup %2455  ;;  %v1028_v52 = vmin.f32 %v3002_v25, 0.0  ;;  %v3012_v41 = vadd.f32 %v2193_v31, %v2890_v55  ;;  %1241 = vrot.lane.b32.xlu0 %v1143_v32, %s2504_s25  ;;  %v1195_v42 = vrot.slane %v2987_v10, 3  ;;  %v1101_v51 = vpack.c.bf16 %v2987_v10, %v2981_v2 }
 0x15c   :  { %v3017_v43 = vsel %vm1008_vm7, %v2930_v22, %v1985_v35  ;;  %v1986_v44 = vadd.f32 -1.0, %v2456_v40  ;;  %v1139_v47 = vsel %vm1126_vm3, %v1110_v34, %v1111_v39  ;;  %vm1012_vm11 = vcmp.gt.f32.partialorder %v3002_v25, 0.0 }
 0x15d   :  { %v1052_v54 = vmul.f32 1.442695, %v1028_v52  ;;  %v1029_v55 = vmin.f32 %v3012_v41, 0.0  ;;  %v2194_v57 = vpop.f32.mrb[52].mxu0  ;;  %v1155_v58 = vrot.slane %v3017_v43, 2  ;;  %v1112_v60 = vrot.slane %v3017_v43, 1 }
 0x15e   :  { %v3027_v59 = vsel %vm1009_vm8, %v2934_v27, %v1986_v44  ;;  %v2195_v22 = vpop.f32.mrb[53].mxu0  ;;  %v1196_v61 = vrot.slane %v3017_v43, 3  ;;  %v1221_v30 = vsel %vm1208_vm4, %v1194_v13, %v1195_v42  ;;  %vm1013_vm12 = vcmp.gt.f32.partialorder %v3012_v41, 0.0 }
 0x15f   :  { %2461 = vpow2.f32 %v1052_v54  ;;  %v1054_v63 = vmul.f32 1.442695, %v1029_v55  ;;  %v2196_v33 = vadd.f32 %v2195_v22, %v2194_v57  ;;  %1289 = vrot.lane.b32.xlu0 %v1225_v14, %s2505_s26  ;;  %v2197_v3 = vpop.f32.mrb[54].mxu0  ;;  %v1179_v4 = vsel %vm1167_vm1, %v1154_v23, %v1155_v58 }
 0x160   :  { %v2198_v27 = vpop.f32.mrb[55].mxu0  ;;  %v1185_v5 = vpack.c.bf16 %v1179_v4, %v1180_v37  ;;  %v1138_v7 = vsel %vm1126_vm3, %v1111_v39, %v1112_v60  ;;  %v1220_v46 = vsel %vm1208_vm4, %v1195_v42, %v1196_v61  ;;  %v1113_v12 = vrot.slane %v3027_v59, 1 }
 0x161   :  { %v2458_v34 = vpop.eup %2457  ;;  %2463 = vpow2.f32 %v1054_v63  ;;  %v3042_v13 = vadd.f32 %v2196_v33, %v2900_v8  ;;  %v2199_v6 = vadd.f32 %v2198_v27, %v2197_v3  ;;  %v1144_v15 = vpack.c.bf16 %v1138_v7, %v1139_v47 }
 0x162   :  { %v1987_v16 = vadd.f32 -1.0, %v2458_v34  ;;  %1267 = vrot.lane.b32.xlu1 %v1185_v5, %s2503_s3  ;;  %v1226_v18 = vpack.c.bf16 %v1220_v46, %v1221_v30  ;;  %v1137_v19 = vsel %vm1126_vm3, %v1112_v60, %v1113_v12  ;;  %v1156_v20 = vrot.slane %v3027_v59, 2 }
 0x163   :  { %v2460_v21 = vpop.eup %2459  ;;  %v1030_v9 = vmin.f32 %v3042_v13, 0.0  ;;  %v3051_v1 = vadd.f32 %v2199_v6, %v2902_v11  ;;  %1243 = vrot.lane.b32.xlu0 %v1144_v15, %s2504_s25  ;;  %v1197_v8 = vrot.slane %v3027_v59, 3  ;;  %v1102_v32 = vpack.c.bf16 %v3027_v59, %v3017_v43 }
 0x164   :  { %v3056_v23 = vsel %vm1010_vm9, %v2956_v56, %v1987_v16  ;;  %v1988_v24 = vadd.f32 -1.0, %v2460_v21  ;;  %v1178_v31 = vsel %vm1167_vm1, %v1155_v58, %v1156_v20  ;;  %vm1014_vm13 = vcmp.gt.f32.partialorder %v3042_v13, 0.0 }
 0x165   :  { %v1056_v35 = vmul.f32 1.442695, %v1030_v9  ;;  %v1031_v11 = vmin.f32 %v3051_v1, 0.0  ;;  %v2200_v14 = vpop.f32.mrb[56].mxu0  ;;  %v1114_v37 = vrot.slane %v3056_v23, 1  ;;  %v1157_v40 = vrot.slane %v3056_v23, 2 }
 0x166   :  { %v3066_v39 = vsel %vm1011_vm10, %v2978_v0, %v1988_v24  ;;  %v2201_v56 = vpop.f32.mrb[57].mxu0  ;;  %1291 = vrot.lane.b32.xlu1 %v1226_v18, %s2505_s26  ;;  %v1198_v52 = vrot.slane %v3056_v23, 3  ;;  %v1219_v42 = vsel %vm1208_vm4, %v1196_v61, %v1197_v8  ;;  %vm1015_vm14 = vcmp.gt.f32.partialorder %v3051_v1, 0.0 }
 0x167   :  { %2465 = vpow2.f32 %v1056_v35  ;;  %v1058_v44 = vmul.f32 1.442695, %v1031_v11  ;;  %v2202_v47 = vadd.f32 %v2201_v56, %v2200_v14  ;;  %v2203_v54 = vpop.f32.mrb[58].mxu0  ;;  %v1136_v55 = vsel %vm1126_vm3, %v1113_v12, %v1114_v37 }
 0x168   :  { %v2204_v57 = vpop.f32.mrb[59].mxu0  ;;  %v1145_v0 = vpack.c.bf16 %v1136_v55, %v1137_v19  ;;  %v1177_v58 = vsel %vm1167_vm1, %v1156_v20, %v1157_v40  ;;  %v1115_v22 = vrot.slane %v3066_v39, 1  ;;  %v1218_v60 = vsel %vm1208_vm4, %v1197_v8, %v1198_v52 }
 0x169   :  { %v2462_v30 = vpop.eup %2461  ;;  %2467 = vpow2.f32 %v1058_v44  ;;  %v3081_v61 = vadd.f32 %v2202_v47, %v2906_v26  ;;  %v2205_v63 = vadd.f32 %v2204_v57, %v2203_v54  ;;  %v1186_v33 = vpack.c.bf16 %v1177_v58, %v1178_v31 }
 0x16a   :  { %v1989_v3 = vadd.f32 -1.0, %v2462_v30  ;;  %1245 = vrot.lane.b32.xlu0 %v1145_v0, %s2504_s25  ;;  %v1135_v4 = vsel %vm1126_vm3, %v1114_v37, %v1115_v22  ;;  %v1227_v27 = vpack.c.bf16 %v1218_v60, %v1219_v42  ;;  %v1158_v5 = vrot.slane %v3066_v39, 2 }
 0x16b   :  { %v2464_v7 = vpop.eup %2463  ;;  %v1032_v46 = vmin.f32 %v3081_v61, 0.0  ;;  %v3090_v12 = vadd.f32 %v2205_v63, %v2908_v29  ;;  %v1199_v26 = vrot.slane %v3066_v39, 3  ;;  %v1103_v16 = vpack.c.bf16 %v3066_v39, %v3056_v23 }
 0x16c   :  { %v3094_v34 = vsel %vm1012_vm11, %v3002_v25, %v1989_v3  ;;  %v1990_v6 = vadd.f32 -1.0, %v2464_v7  ;;  %v1176_v15 = vsel %vm1167_vm1, %v1157_v40, %v1158_v5  ;;  %vm1016_vm15 = vcmp.gt.f32.partialorder %v3081_v61, 0.0 }
 0x16d   :  { %v1060_v18 = vmul.f32 1.442695, %v1032_v46  ;;  %v1033_v19 = vmin.f32 %v3090_v12, 0.0  ;;  %v2206_v20 = vpop.f32.mrb[60].mxu0  ;;  %v1116_v29 = vrot.slane %v3094_v34, 1  ;;  %v1159_v9 = vrot.slane %v3094_v34, 2 }
 0x16e   :  { %v3104_v21 = vsel %vm1013_vm12, %v3012_v41, %v1990_v6  ;;  %v2207_v25 = vpop.f32.mrb[61].mxu0  ;;  %1269 = vrot.lane.b32.xlu0 %v1186_v33, %s2503_s3  ;;  %v1200_v8 = vrot.slane %v3094_v34, 3  ;;  %v1217_v24 = vsel %vm1208_vm4, %v1198_v52, %v1199_v26  ;;  %vm1017_vm0 = vcmp.gt.f32.partialorder %v3090_v12, 0.0 }
 0x16f   :  { %2469 = vpow2.f32 %v1060_v18  ;;  %v1062_v31 = vmul.f32 1.442695, %v1033_v19  ;;  %v2208_v35 = vadd.f32 %v2207_v25, %v2206_v20  ;;  %v2209_v11 = vpop.f32.mrb[62].mxu0  ;;  %v1134_v14 = vsel %vm1126_vm3, %v1115_v22, %v1116_v29 }
 0x170   :  { %v2210_v37 = vpop.f32.mrb[63].mxu0  ;;  %v1146_v41 = vpack.c.bf16 %v1134_v14, %v1135_v4  ;;  %v1175_v56 = vsel %vm1167_vm1, %v1158_v5, %v1159_v9  ;;  %v1216_v40 = vsel %vm1208_vm4, %v1199_v26, %v1200_v8  ;;  %v1117_v42 = vrot.slane %v3104_v21, 1 }
 0x171   :  { %v2466_v44 = vpop.eup %2465  ;;  %2471 = vpow2.f32 %v1062_v31  ;;  %v3119_v52 = vadd.f32 %v2208_v35, %v2912_v45  ;;  %v2211_v47 = vadd.f32 %v2210_v37, %v2209_v11  ;;  %v1187_v54 = vpack.c.bf16 %v1175_v56, %v1176_v15 }
 0x172   :  { %v1991_v55 = vadd.f32 -1.0, %v2466_v44  ;;  %1247 = vrot.lane.b32.xlu1 %v1146_v41, %s2504_s25  ;;  %1293 = vrot.lane.b32.xlu0 %v1227_v27, %s2505_s26  ;;  %v1228_v57 = vpack.c.bf16 %v1216_v40, %v1217_v24  ;;  %v1133_v0 = vsel %vm1126_vm3, %v1116_v29, %v1117_v42  ;;  %v1160_v58 = vrot.slane %v3104_v21, 2 }
 0x173   :  { %v2468_v22 = vpop.eup %2467  ;;  %v1034_v60 = vmin.f32 %v3119_v52, 0.0  ;;  %v3129_v45 = vadd.f32 %v2211_v47, %v2914_v50  ;;  %v1201_v30 = vrot.slane %v3104_v21, 3  ;;  %v1104_v4 = vpack.c.bf16 %v3104_v21, %v3094_v34 }
 0x174   :  { %v3133_v63 = vsel %vm1014_vm13, %v3042_v13, %v1991_v55  ;;  %v1992_v33 = vadd.f32 -1.0, %v2468_v22  ;;  %v1174_v3 = vsel %vm1167_vm1, %v1159_v9, %v1160_v58  ;;  %vm1018_vm2 = vcmp.gt.f32.partialorder %v3119_v52, 0.0 }
 0x175   :  { %v1064_v27 = vmul.f32 1.442695, %v1034_v60  ;;  %v1035_v5 = vmin.f32 %v3129_v45, 0.0  ;;  %v1118_v50 = vrot.slane %v3133_v63, 1  ;;  %v1161_v13 = vrot.slane %v3133_v63, 2 }
 0x176   :  { %v3143_v7 = vsel %vm1015_vm14, %v3051_v1, %v1992_v33  ;;  %1271 = vrot.lane.b32.xlu1 %v1187_v54, %s2503_s3  ;;  %v1202_v46 = vrot.slane %v3133_v63, 3  ;;  %v1215_v26 = vsel %vm1208_vm4, %v1200_v8, %v1201_v30  ;;  %vm1019_vm5 = vcmp.gt.f32.partialorder %v3129_v45, 0.0 }
 0x177   :  { %2473 = vpow2.f32 %v1064_v27  ;;  %v1066_v6 = vmul.f32 1.442695, %v1035_v5  ;;  %v1132_v15 = vsel %vm1126_vm3, %v1117_v42, %v1118_v50  ;;  %v1119_v18 = vrot.slane %v3143_v7, 1 }
 0x178   :  { %v1147_v19 = vpack.c.bf16 %v1132_v15, %v1133_v0  ;;  %v1173_v1 = vsel %vm1167_vm1, %v1160_v58, %v1161_v13  ;;  %v1214_v20 = vsel %vm1208_vm4, %v1201_v30, %v1202_v46  ;;  %v1162_v29 = vrot.slane %v3143_v7, 2 }
 0x179   :  { %v2470_v25 = vpop.eup %2469  ;;  %2475 = vpow2.f32 %v1066_v6  ;;  %v1188_v9 = vpack.c.bf16 %v1173_v1, %v1174_v3  ;;  %v1131_v8 = vsel %vm1126_vm3, %v1118_v50, %v1119_v18  ;;  %v1229_v24 = vpack.c.bf16 %v1214_v20, %v1215_v26 }
 0x17a   :  { %v1993_v31 = vadd.f32 -1.0, %v2470_v25  ;;  %1295 = vrot.lane.b32.xlu1 %v1228_v57, %s2505_s26  ;;  %1249 = vrot.lane.b32.xlu0 %v1147_v19, %s2504_s25  ;;  %v1172_v35 = vsel %vm1167_vm1, %v1161_v13, %v1162_v29  ;;  %v1203_v11 = vrot.slane %v3143_v7, 3  ;;  %v1105_v14 = vpack.c.bf16 %v3143_v7, %v3133_v63 }
 0x17b   :  { %v2472_v37 = vpop.eup %2471 }
 0x17c   :  { %v3169_v41 = vsel %vm1016_vm15, %v3081_v61, %v1993_v31  ;;  %v1994_v56 = vadd.f32 -1.0, %v2472_v37  ;;  %v1213_v40 = vsel %vm1208_vm4, %v1202_v46, %v1203_v11 }
 0x17d   :  { %v1120_v42 = vrot.slane %v3169_v41, 1  ;;  %v1163_v44 = vrot.slane %v3169_v41, 2  ;;  %v1204_v47 = vrot.slane %v3169_v41, 3 }
 0x17e   :  { %v3178_v54 = vsel %vm1017_vm0, %v3090_v12, %v1994_v56  ;;  %1273 = vrot.lane.b32.xlu0 %v1188_v9, %s2503_s3  ;;  %vm1692_vm0 = vcmask 1041409  }
 0x17f   :  { %v1130_v61 = vsel %vm1126_vm3, %v1119_v18, %v1120_v42  ;;  %v1171_v55 = vsel %vm1167_vm1, %v1162_v29, %v1163_v44  ;;  %v1212_v57 = vsel %vm1208_vm4, %v1203_v11, %v1204_v47  ;;  %v1121_v0 = vrot.slane %v3178_v54, 1 }
 0x180   :  { %v1148_v58 = vpack.c.bf16 %v1130_v61, %v1131_v8  ;;  %v1189_v22 = vpack.c.bf16 %v1171_v55, %v1172_v35  ;;  %v1230_v60 = vpack.c.bf16 %v1212_v57, %v1213_v40  ;;  %v1164_v30 = vrot.slane %v3178_v54, 2 }
 0x181   :  { %v2474_v12 = vpop.eup %2473  ;;  %v1129_v33 = vsel %vm1126_vm3, %v1120_v42, %v1121_v0  ;;  %v1205_v3 = vrot.slane %v3178_v54, 3  ;;  %v1106_v27 = vpack.c.bf16 %v3178_v54, %v3169_v41  ;;  %v2435_v41 = vld [vmem:[%s3425_s5] sm:$0xff]   ;;  %v2506_v54 = vmov 0.0  }
 0x182   :  { %v1995_v5 = vadd.f32 -1.0, %v2474_v12  ;;  %1251 = vrot.lane.b32.xlu1 %v1148_v58, %s2504_s25  ;;  %1297 = vrot.lane.b32.xlu0 %v1229_v24, %s2505_s26  ;;  %v1170_v50 = vsel %vm1167_vm1, %v1163_v44, %v1164_v30 }
 0x183   :  { %v2476_v13 = vpop.eup %2475  ;;  %v1211_v46 = vsel %vm1208_vm4, %v1204_v47, %v1205_v3  ;;  %2272 = vmatprep.subr.bf16.mxu1 %v2506_v54 }
 0x184   :  { %v3202_v26 = vsel %vm1018_vm2, %v3119_v52, %v1995_v5  ;;  %v1996_v6 = vadd.f32 -1.0, %v2476_v13  ;;  %vm1694_vm2 = vcmask 1042434  }
 0x185   :  { %v1122_v15 = vrot.slane %v3202_v26, 1  ;;  %v1165_v18 = vrot.slane %v3202_v26, 2  ;;  %v1206_v19 = vrot.slane %v3202_v26, 3 }
 0x186   :  { %v3209_v1 = vsel %vm1019_vm5, %v3129_v45, %v1996_v6  ;;  %1275 = vrot.lane.b32.xlu1 %v1189_v22, %s2503_s3  ;;  %vm1696_vm5 = vcmask 1043459  }
 0x187   :  { %v1128_v20 = vsel %vm1126_vm3, %v1121_v0, %v1122_v15  ;;  %v1123_v52 = vrot.slane %v3209_v1, 1  ;;  %v1169_v29 = vsel %vm1167_vm1, %v1164_v30, %v1165_v18  ;;  %v1166_v25 = vrot.slane %v3209_v1, 2 }
 0x188   :  { %v1149_v9 = vpack.c.bf16 %v1128_v20, %v1129_v33  ;;  %v1190_v8 = vpack.c.bf16 %v1169_v29, %v1170_v50  ;;  %v1210_v24 = vsel %vm1208_vm4, %v1205_v3, %v1206_v19  ;;  %v1207_v45 = vrot.slane %v3209_v1, 3 }
 0x189   :  { %v1127_v31 = vsel %vm1126_vm3, %v1122_v15, %v1123_v52  ;;  %v1142_v35 = vsel %vm1126_vm3, %v1123_v52, %v1108_v17  ;;  %v1168_v11 = vsel %vm1167_vm1, %v1165_v18, %v1166_v25  ;;  %v1183_v37 = vsel %vm1167_vm1, %v1166_v25, %v1151_v38 }
 0x18a   :  { %1299 = vrot.lane.b32.xlu1 %v1230_v60, %s2505_s26  ;;  %1253 = vrot.lane.b32.xlu0 %v1149_v9, %s2504_s25  ;;  %v1150_v56 = vpack.c.bf16 %v1142_v35, %v1127_v31  ;;  %v1191_v40 = vpack.c.bf16 %v1183_v37, %v1168_v11  ;;  %v1231_v42 = vpack.c.bf16 %v1210_v24, %v1211_v46  ;;  %vm1305_vm1 = vcmask 261120   ;;  %v2437_v31 = vld [vmem:[%s3425_s5 + $0x10] sm:$0xff]   ;;  %v2438_v35 = vld [vmem:[%s3425_s5 + $0x18] sm:$0xff]  }
 0x18b   :  { %v1209_v44 = vsel %vm1208_vm4, %v1206_v19, %v1207_v45  ;;  %v1224_v17 = vsel %vm1208_vm4, %v1207_v45, %v1192_v48  ;;  %v1107_v47 = vpack.c.bf16 %v3209_v1, %v3202_v26  ;;  %vm1330_vm3 = vcmask 523264   ;;  %v2439_v11 = vld [vmem:[%s3425_s5 + $0x20] sm:$0xff]   ;;  %v2440_v37 = vld [vmem:[%s3425_s5 + $0x28] sm:$0xff]  }
 0x18c   :  { %v1232_v61 = vpack.c.bf16 %v1224_v17, %v1209_v44  ;;  %vm1347_vm4 = vcmask 785408   ;;  %v2508_v44 = vmov 0  }
 0x18e   :  { %1255 = vrot.lane.b32.xlu1 %v1150_v56, %s2504_s25  ;;  %1277 = vrot.lane.b32.xlu0 %v1190_v8, %s2503_s3  ;;  %v2441_v56 = vld [vmem:[%s3425_s5 + $0x30] sm:$0xff]  }
 0x192   :  { %1279 = vrot.lane.b32.xlu1 %v1191_v40, %s2503_s3  ;;  %1301 = vrot.lane.b32.xlu0 %v1231_v42, %s2505_s26  ;;  %v2442_v40 = vld [vmem:[%s3425_s5 + $0x38] sm:$0xff]   ;;  %v1557_v42 = vand.u32 127, %v1124_v49 }
 0x194   :  { %vm1559_vm7 = vcmp.lt.s32.totalorder %v1557_v42, 16  ;;  %vm1562_vm8 = vcmp.ge.s32.totalorder %v1557_v42, 16  ;;  %vm1563_vm9 = vcmp.lt.s32.totalorder %v1557_v42, 32  ;;  %vm1566_vm11 = vcmp.ge.s32.totalorder %v1557_v42, 32 }
 0x195   :  { %v1561_v17 = vsel %vm1559_vm7, 14, %v2508_v44  ;;  %vm1564_vm10 = vmand %vm1562_vm8, %vm1563_vm9  ;;  %vm1567_vm12 = vcmp.lt.s32.totalorder %v1557_v42, 48  ;;  %vm1702_vm7 = vcmask 1046534   ;;  %vm1704_vm8 = vcmask 1047559  }
 0x196   :  { %1303 = vrot.lane.b32.xlu1 %v1232_v61, %s2505_s26  ;;  %v1565_v61 = vsel %vm1564_vm10, 13, %v1561_v17  ;;  %vm1568_vm13 = vmand %vm1566_vm11, %vm1567_vm12 }
 0x1cc   :  { %v1266_v55 = vpop.permute.xlu1 %1265 }
 0x1cd   :  { %v1242_v38 = vpop.permute.xlu0 %1241 }
 0x1ce   :  { %v1308_v48 = vsel %vm1305_vm1, %v1100_v53, %v1242_v38 }
 0x1cf   :  { %v1332_v0 = vsel %vm1330_vm3, %v1308_v48, %v1266_v55  ;;  %v1570_v55 = vadd.s32 8, %v2927_v62  ;;  %v1569_v48 = vsel %vm1568_vm13, 12, %v1565_v61 }
 0x1d0   :  { %vm3339_vm14 = vcmp.le.s32.totalorder %v2927_v62, %v1569_v48 }
 0x1d1   :  { %v1290_v57 = vpop.permute.xlu0 %1289  ;;  %vm3343_vm15 = vcmp.le.s32.totalorder %v1570_v55, %v1569_v48 }
 0x1d2   :  { %v1349_v58 = vsel %vm1347_vm4, %v1332_v0, %v1290_v57 }
 0x1d3   :  { %2256 = vmatprep.mubr.bf16.mxu1 %v1349_v58 }
 0x1d4   :  { %v1268_v22 = vpop.permute.xlu1 %1267 }
 0x1d5   :  { %v1244_v60 = vpop.permute.xlu0 %1243 }
 0x1d6   :  { %v1311_v30 = vsel %vm1305_vm1, %v1101_v51, %v1244_v60 }
 0x1d7   :  { %v1334_v28 = vsel %vm1330_vm3, %v1311_v30, %v1268_v22 }
 0x1d8   :  { %v1292_v12 = vpop.permute.xlu1 %1291 }
 0x1d9   :  { %v1352_v36 = vsel %vm1347_vm4, %v1334_v28, %v1292_v12 }
 0x1da   :  { %2257 = vmatmul.mubr.bf16.vlgmr.msra.gmra.mrb[32].mxu1 %v1352_v36 }
 0x1db   :  { %2273 = vmatpush3.bf16.msra.mxu1 %v2435_v41 }
 0x1dc   :  { %v1246_v53 = vpop.permute.xlu0 %1245  ;;  %2274 = vmatprep.subr.bf16.mxu1 %v2506_v54 }
 0x1dd   :  { %v1314_v3 = vsel %vm1305_vm1, %v1102_v32, %v1246_v53 }
 0x1e0   :  { %v1270_v33 = vpop.permute.xlu0 %1269 }
 0x1e1   :  { %v1336_v5 = vsel %vm1330_vm3, %v1314_v3, %v1270_v33 }
 0x1e4   :  { %v1248_v50 = vpop.permute.xlu1 %1247  ;;  %v1294_v13 = vpop.permute.xlu0 %1293 }
 0x1e5   :  { %v1355_v2 = vsel %vm1347_vm4, %v1336_v5, %v1294_v13  ;;  %v1317_v51 = vsel %vm1305_vm1, %v1103_v16, %v1248_v50 }
 0x1e6   :  { %2260 = vmatprep.mubr.bf16.mxu1 %v1355_v2 }
 0x1e8   :  { %v1272_v10 = vpop.permute.xlu1 %1271 }
 0x1e9   :  { %v1338_v46 = vsel %vm1330_vm3, %v1317_v51, %v1272_v10 }
 0x1ec   :  { %v1296_v26 = vpop.permute.xlu1 %1295  ;;  %v1250_v6 = vpop.permute.xlu0 %1249 }
 0x1ed   :  { %v1358_v43 = vsel %vm1347_vm4, %v1338_v46, %v1296_v26  ;;  %v1320_v32 = vsel %vm1305_vm1, %v1104_v4, %v1250_v6 }
 0x1ee   :  { %2261 = vmatmul.mubr.bf16.gmra.mrb[36].mxu1 %v1358_v43 }
 0x1f0   :  { %v1274_v59 = vpop.permute.xlu0 %1273 }
 0x1f1   :  { %v1340_v15 = vsel %vm1330_vm3, %v1320_v32, %v1274_v59 }
 0x1f4   :  { %v1252_v18 = vpop.permute.xlu1 %1251  ;;  %v1298_v19 = vpop.permute.xlu0 %1297 }
 0x1f5   :  { %v1361_v23 = vsel %vm1347_vm4, %v1340_v15, %v1298_v19  ;;  %v1323_v16 = vsel %vm1305_vm1, %v1105_v14, %v1252_v18 }
 0x1f6   :  { %2264 = vmatprep.mubr.bf16.mxu1 %v1361_v23 }
 0x1f8   :  { %v1276_v39 = vpop.permute.xlu1 %1275 }
 0x1f9   :  { %v1342_v1 = vsel %vm1330_vm3, %v1323_v16, %v1276_v39 }
 0x1fc   :  { %v1300_v20 = vpop.permute.xlu1 %1299  ;;  %v1254_v52 = vpop.permute.xlu0 %1253 }
 0x1fd   :  { %v1364_v34 = vsel %vm1347_vm4, %v1342_v1, %v1300_v20  ;;  %v1326_v29 = vsel %vm1305_vm1, %v1106_v27, %v1254_v52  ;;  %v2436_v27 = vld [vmem:[%s3425_s5 + $0x8] sm:$0xff]  }
 0x1fe   :  { %2265 = vmatmul.mubr.bf16.gmra.mrb[40].mxu1 %v1364_v34 }
 0x1ff   :  { %2275 = vmatpush3.bf16.msra.mxu1 %v2436_v27 }
 0x200   :  { %v1256_v21 = vpop.permute.xlu1 %1255  ;;  %v1278_v4 = vpop.permute.xlu0 %1277  ;;  %2276 = vmatprep.subr.bf16.mxu1 %v2506_v54 }
 0x201   :  { %v1344_v25 = vsel %vm1330_vm3, %v1326_v29, %v1278_v4  ;;  %v1329_v14 = vsel %vm1305_vm1, %v1107_v47, %v1256_v21  ;;  %v3332_v47 = vld [vmem:[%s3424_s4] ss:$0 sm:$0xff] }
 0x203   :  { %2277 = vmatpush3.bf16.msra.mxu1 %v2437_v31 }
 0x204   :  { %v1280_v9 = vpop.permute.xlu1 %1279  ;;  %v1302_v63 = vpop.permute.xlu0 %1301  ;;  %2278 = vmatprep.subr.bf16.mxu1 %v2506_v54 }
 0x205   :  { %v1367_v7 = vsel %vm1347_vm4, %v1344_v25, %v1302_v63  ;;  %v1346_v8 = vsel %vm1330_vm3, %v1329_v14, %v1280_v9  ;;  %vm1698_vm3 = vcmask 1044484  }
 0x206   :  { %2268 = vmatprep.mubr.bf16.mxu1 %v1367_v7 }
 0x207   :  { %2279 = vmatpush3.bf16.msra.mxu1 %v2438_v35 }
 0x208   :  { %v1304_v24 = vpop.permute.xlu1 %1303  ;;  %2280 = vmatprep.subr.bf16.mxu1 %v2506_v54 }
 0x209   :  { %v1370_v45 = vsel %vm1347_vm4, %v1346_v8, %v1304_v24  ;;  %vm1700_vm4 = vcmask 1045509  }
 0x20a   :  { %2269 = vmatmul.mubr.bf16.gmra.mrb[44].mxu1 %v1370_v45 }
 0x20b   :  { %2281 = vmatpush3.bf16.msra.mxu1 %v2439_v11  ;;  %2288 = vmatprep.mubr.msk.bf16.mxu1 %vm2507_vm6, %v2506_v54 }
 0x20c   :  { %2282 = vmatprep.subr.bf16.mxu1 %v2506_v54 }
 0x20f   :  { %2283 = vmatpush3.bf16.msra.mxu1 %v2440_v37 }
 0x210   :  { %2284 = vmatprep.subr.bf16.mxu1 %v2506_v54 }
 0x213   :  { %2285 = vmatpush3.bf16.msra.mxu1 %v2441_v56 }
 0x214   :  { %2286 = vmatprep.subr.bf16.mxu1 %v2506_v54 }
 0x217   :  { %2287 = vmatpush3.bf16.msra.mxu1 %v2442_v40 }
 0x218   :  { %2292 = vmatprep.subr.bf16.mxu1 %v2506_v54 }
 0x2ad   :  { %v2258_v38 = vpop.f32.mrb[32].mxu1 }
 0x2ae   :  { %v1486_v49 = vadd.f32 %v2258_v38, %v3332_v47  ;;  %v1477_v57 = vpop.f32.mrb[33].mxu1 }
 0x2af   :  { %v1478_v0 = vadd.f32 %v3332_v47, %v1477_v57  ;;  %v2259_v58 = vpop.f32.mrb[34].mxu1 }
 0x2b0   :  { %v1542_v22 = vmax.f32 %v1486_v49, 0.0  ;;  %v1489_v60 = vadd.f32 %v2259_v58, %v3332_v47  ;;  %v1480_v30 = vpop.f32.mrb[35].mxu1 }
 0x2b1   :  { %v1540_v28 = vmax.f32 %v1478_v0, 0.0  ;;  %v1481_v53 = vadd.f32 %v3332_v47, %v1480_v30 }
 0x2b2   :  { %v1543_v33 = vmax.f32 %v1489_v60, 0.0  ;;  %v1575_v5 = vsel %vm3339_vm14, %v1542_v22, 0.0 }
 0x2b3   :  { %v1541_v3 = vmax.f32 %v1481_v53, 0.0  ;;  %v1573_v62 = vsel %vm3339_vm14, %v1540_v28, 0.0 }
 0x2b4   :  { %v1576_v50 = vsel %vm3343_vm15, %v1543_v33, 0.0 }
 0x2b5   :  { %v1596_v13 = vmax.f32 %v1575_v5, %v1576_v50  ;;  %v1574_v2 = vsel %vm3343_vm15, %v1541_v3, 0.0 }
 0x2b6   :  { %v1589_v10 = vmax.f32 %v1573_v62, %v1574_v2 }
 0x2b7   :  { %v1597_v51 = vrot.slane %v1596_v13, 4 }
 0x2b8   :  { %v1590_v46 = vrot.slane %v1589_v10, 4 }
 0x2b9   :  { %v1598_v26 = vmax.f32 %v1596_v13, %v1597_v51 }
 0x2ba   :  { %v1591_v6 = vmax.f32 %v1589_v10, %v1590_v46 }
 0x2bb   :  { %v1599_v43 = vrot.slane %v1598_v26, 2 }
 0x2bc   :  { %v1592_v59 = vrot.slane %v1591_v6, 2 }
 0x2bd   :  { %v1600_v32 = vmax.f32 %v1598_v26, %v1599_v43 }
 0x2be   :  { %v1593_v15 = vmax.f32 %v1591_v6, %v1592_v59 }
 0x2bf   :  { %v1601_v18 = vrot.slane %v1600_v32, 1 }
 0x2c0   :  { %v1594_v19 = vrot.slane %v1593_v15, 1 }
 0x2c1   :  { %v1602_v23 = vmax.f32 %v1600_v32, %v1601_v18  ;;  %v2262_v39 = vpop.f32.mrb[36].mxu1 }
 0x2c2   :  { %v1595_v16 = vmax.f32 %v1593_v15, %v1594_v19  ;;  %v1502_v1 = vadd.f32 %v2262_v39, %v3332_v47  ;;  %v1493_v20 = vpop.f32.mrb[37].mxu1 }
 0x2c3   :  { %v1646_v52 = vpack.c.bf16 %v1602_v23, %v1602_v23  ;;  %v1494_v34 = vadd.f32 %v3332_v47, %v1493_v20  ;;  %v2263_v21 = vpop.f32.mrb[38].mxu1 }
 0x2c4   :  { %v1645_v4 = vpack.c.bf16 %v1595_v16, %v1595_v16  ;;  %v1546_v29 = vmax.f32 %v1502_v1, 0.0  ;;  %v1505_v25 = vadd.f32 %v2263_v21, %v3332_v47  ;;  %v1496_v9 = vpop.f32.mrb[39].mxu1 }
 0x2c5   :  { %v1685_v63 = vunpack.c.l.b16 %v1646_v52  ;;  %v1544_v7 = vmax.f32 %v1494_v34, 0.0  ;;  %v1497_v14 = vadd.f32 %v3332_v47, %v1496_v9 }
 0x2c6   :  { %v1684_v8 = vunpack.c.l.b16 %v1645_v4  ;;  %v1547_v24 = vmax.f32 %v1505_v25, 0.0  ;;  %v1579_v27 = vsel %vm3339_vm14, %v1546_v29, 0.0 }
 0x2c7   :  { %v1545_v45 = vmax.f32 %v1497_v14, 0.0  ;;  %v1577_v35 = vsel %vm3339_vm14, %v1544_v7, 0.0 }
 0x2c8   :  { %v1693_v41 = vsel %vm1692_vm0, %v1685_v63, %v1684_v8  ;;  %v1580_v31 = vsel %vm3343_vm15, %v1547_v24, 0.0 }
 0x2c9   :  { %v1610_v11 = vmax.f32 %v1579_v27, %v1580_v31  ;;  %v1578_v37 = vsel %vm3343_vm15, %v1545_v45, 0.0 }
 0x2ca   :  { %v1603_v56 = vmax.f32 %v1577_v35, %v1578_v37 }
 0x2cb   :  { %v1611_v40 = vrot.slane %v1610_v11, 4 }
 0x2cc   :  { %v1604_v42 = vrot.slane %v1603_v56, 4 }
 0x2cd   :  { %v1612_v44 = vmax.f32 %v1610_v11, %v1611_v40 }
 0x2ce   :  { %v1605_v17 = vmax.f32 %v1603_v56, %v1604_v42 }
 0x2cf   :  { %v1613_v61 = vrot.slane %v1612_v44, 2 }
 0x2d0   :  { %v1606_v38 = vrot.slane %v1605_v17, 2 }
 0x2d1   :  { %v1614_v55 = vmax.f32 %v1612_v44, %v1613_v61  ;;  %v2266_v49 = vpop.f32.mrb[40].mxu1 }
 0x2d2   :  { %v1607_v48 = vmax.f32 %v1605_v17, %v1606_v38  ;;  %v1518_v57 = vadd.f32 %v2266_v49, %v3332_v47  ;;  %v1509_v0 = vpop.f32.mrb[41].mxu1 }
 0x2d3   :  { %v1615_v58 = vrot.slane %v1614_v55, 1  ;;  %v1510_v22 = vadd.f32 %v3332_v47, %v1509_v0  ;;  %v2267_v60 = vpop.f32.mrb[42].mxu1 }
 0x2d4   :  { %v1608_v30 = vrot.slane %v1607_v48, 1  ;;  %v1550_v28 = vmax.f32 %v1518_v57, 0.0  ;;  %v1521_v53 = vadd.f32 %v2267_v60, %v3332_v47  ;;  %v1512_v33 = vpop.f32.mrb[43].mxu1 }
 0x2d5   :  { %v1616_v3 = vmax.f32 %v1614_v55, %v1615_v58  ;;  %v1548_v5 = vmax.f32 %v1510_v22, 0.0  ;;  %v1513_v50 = vadd.f32 %v3332_v47, %v1512_v33 }
 0x2d6   :  { %v1609_v62 = vmax.f32 %v1607_v48, %v1608_v30  ;;  %v1551_v13 = vmax.f32 %v1521_v53, 0.0  ;;  %v1583_v46 = vsel %vm3339_vm14, %v1550_v28, 0.0 }
 0x2d7   :  { %v1648_v2 = vpack.c.bf16 %v1616_v3, %v1616_v3  ;;  %v1549_v10 = vmax.f32 %v1513_v50, 0.0  ;;  %v1581_v6 = vsel %vm3339_vm14, %v1548_v5, 0.0 }
 0x2d8   :  { %v1647_v51 = vpack.c.bf16 %v1609_v62, %v1609_v62  ;;  %v1584_v26 = vsel %vm3343_vm15, %v1551_v13, 0.0 }
 0x2d9   :  { %v1624_v43 = vmax.f32 %v1583_v46, %v1584_v26  ;;  %v1582_v59 = vsel %vm3343_vm15, %v1549_v10, 0.0  ;;  %v1687_v18 = vunpack.c.l.b16 %v1648_v2 }
 0x2da   :  { %v1686_v32 = vunpack.c.l.b16 %v1647_v51  ;;  %v1617_v15 = vmax.f32 %v1581_v6, %v1582_v59  ;;  %v2443_v6 = vld [vmem:[%s3427_s7] sm:$0xff]  }
 0x2db   :  { %v1625_v19 = vrot.slane %v1624_v43, 4  ;;  %v2006_v59 = vld [vmem:[%s3426_s6] ss:$0 sm:$0xff]  ;;  %s2509_s6 = smov [#allocation2]  }
 0x2dc   :  { %v1695_v23 = vsel %vm1694_vm2, %v1686_v32, %v1693_v41  ;;  %v1618_v39 = vrot.slane %v1617_v15, 4  ;;  %s1876_s25 = sshll.u32 %s2509_s6, 4  ;;  %s1877_s25 = int_to_ptr.vmem [resolvable:$true] %s1876_s25 }
 0x2dd   :  { %v1626_v16 = vmax.f32 %v1624_v43, %v1625_v19  ;;  %v1697_v1 = vsel %vm1696_vm5, %v1687_v18, %v1695_v23  ;;  %v2270_v20 = vpop.f32.mrb[44].mxu1  ;;  %v2444_v43 = vld [vmem:[%s3427_s7 + $0x8] sm:$0xff]   ;;  %s2479_s26 = scalar_lea.vmem %s1877_s25, 128  ;;  %p2484_p1 = scmp.lt.s32.totalorder %s1877_s25, %s1877_s25 }
 0x2de   :  { %v1619_v52 = vmax.f32 %v1617_v15, %v1618_v39  ;;  %v1534_v34 = vadd.f32 %v2270_v20, %v3332_v47  ;;  %v1525_v21 = vpop.f32.mrb[45].mxu1  ;;  %p2480_p0 = scmp.ne.s32.totalorder %s1877_s25, %s2479_s26  ;;  %p2485_p2 = scmp.lt.s32.totalorder %s2479_s26, %s2479_s26 }
 0x2df   :  { %v1627_v4 = vrot.slane %v1626_v16, 2  ;;  %v1526_v29 = vadd.f32 %v3332_v47, %v1525_v21  ;;  %v2271_v25 = vpop.f32.mrb[46].mxu1 }
 0x2e0   :  { %v1620_v9 = vrot.slane %v1619_v52, 2  ;;  %v1554_v63 = vmax.f32 %v1534_v34, 0.0  ;;  %v1537_v7 = vadd.f32 %v2271_v25, %v3332_v47  ;;  %v1528_v14 = vpop.f32.mrb[47].mxu1  ;;  %p2486_p3 = por %p2485_p2, %p2484_p1 }
 0x2e1   :  { %v1628_v8 = vmax.f32 %v1626_v16, %v1627_v4  ;;  %v1552_v24 = vmax.f32 %v1526_v29, 0.0  ;;  %v1529_v45 = vadd.f32 %v3332_v47, %v1528_v14 }
 0x2e2   :  { %v1621_v41 = vmax.f32 %v1619_v52, %v1620_v9  ;;  %v1555_v27 = vmax.f32 %v1537_v7, 0.0  ;;  %v1587_v37 = vsel %vm3339_vm14, %v1554_v63, 0.0  ;;  %p2487_p4 = pnand %p2486_p3, %p2480_p0 }
 0x2e3   :  { %v1629_v31 = vrot.slane %v1628_v8, 1  ;;  %v1553_v35 = vmax.f32 %v1529_v45, 0.0  ;;  %v1585_v42 = vsel %vm3339_vm14, %v1552_v24, 0.0 }
 0x2e4   :  { %v1622_v11 = vrot.slane %v1621_v41, 1  ;;  %v1588_v56 = vsel %vm3343_vm15, %v1555_v27, 0.0 }
 0x2e5   :  { %v1630_v40 = vmax.f32 %v1628_v8, %v1629_v31  ;;  %v1638_v44 = vmax.f32 %v1587_v37, %v1588_v56  ;;  %v1586_v17 = vsel %vm3343_vm15, %v1553_v35, 0.0 }
 0x2e6   :  { %v1623_v47 = vmax.f32 %v1621_v41, %v1622_v11  ;;  %v1631_v61 = vmax.f32 %v1585_v42, %v1586_v17 }
 0x2e7   :  { %v1650_v38 = vpack.c.bf16 %v1630_v40, %v1630_v40  ;;  %v1639_v55 = vrot.slane %v1638_v44, 4 }
 0x2e8   :  { %v1649_v49 = vpack.c.bf16 %v1623_v47, %v1623_v47  ;;  %v1632_v48 = vrot.slane %v1631_v61, 4 }
 0x2e9   :  { %v1640_v57 = vmax.f32 %v1638_v44, %v1639_v55  ;;  %v1689_v22 = vunpack.c.l.b16 %v1650_v38 }
 0x2ea   :  { %v1688_v0 = vunpack.c.l.b16 %v1649_v49  ;;  %v1633_v58 = vmax.f32 %v1631_v61, %v1632_v48 }
 0x2eb   :  { %v1641_v60 = vrot.slane %v1640_v57, 2 }
 0x2ec   :  { %v1699_v30 = vsel %vm1698_vm3, %v1688_v0, %v1697_v1  ;;  %v1634_v12 = vrot.slane %v1633_v58, 2 }
 0x2ed   :  { %v1642_v28 = vmax.f32 %v1640_v57, %v1641_v60  ;;  %v1701_v53 = vsel %vm1700_vm4, %v1689_v22, %v1699_v30 }
 0x2ee   :  { %v1635_v33 = vmax.f32 %v1633_v58, %v1634_v12 }
 0x2ef   :  { %v1643_v36 = vrot.slane %v1642_v28, 1 }
 0x2f0   :  { %v1636_v3 = vrot.slane %v1635_v33, 1 }
 0x2f1   :  { %v1644_v5 = vmax.f32 %v1642_v28, %v1643_v36 }
 0x2f2   :  { %v1637_v50 = vmax.f32 %v1635_v33, %v1636_v3 }
 0x2f3   :  { %v1652_v62 = vpack.c.bf16 %v1644_v5, %v1644_v5 }
 0x2f4   :  { %v1651_v13 = vpack.c.bf16 %v1637_v50, %v1637_v50 }
 0x2f5   :  { %v1691_v10 = vunpack.c.l.b16 %v1652_v62 }
 0x2f6   :  { %v1690_v2 = vunpack.c.l.b16 %v1651_v13 }
 0x2f8   :  { %v1703_v51 = vsel %vm1702_vm7, %v1690_v2, %v1701_v53 }
 0x2f9   :  { %v1705_v46 = vsel %vm1704_vm8, %v1691_v10, %v1703_v51 }
 0x2fa   :  { %v1706_v26 = vpack.c.b16 %v1705_v46, %v1705_v46 }
 0x2fc   :  { %2289 = vmatmul.mubr.bf16.vlgmr.msra.gmra.mrb[48].mxu1 %v1706_v26 }
 0x2fd   :  { %2296 = vmatprep.mubr.msk.bf16.mxu1 %vm2507_vm6, %v2506_v54  ;;  %2293 = vmatpush3.bf16.msra.mxu1 %v2443_v6 }
 0x2fe   :  { %2294 = vmatprep.subr.bf16.mxu1 %v2506_v54  ;;  %v2016_v54 = vld [vmem:[%s3428_s8] ss:$0 sm:$0xff] }
 0x301   :  { %2295 = vmatpush3.bf16.msra.mxu1 %v2444_v43 }
 0x3cf   :  { %v1790_v32 = vpop.f32.mrb[48].mxu1 }
 0x3d0   :  { %v1791_v15 = vadd.f32 %v2006_v59, %v1790_v32  ;;  %v2290_v18 = vpop.f32.mrb[49].mxu1 }
 0x3d1   :  { %v1793_v19 = vpop.f32.mrb[50].mxu1 }
 0x3d2   :  { %v1797_v23 = vmin.f32 %v1791_v15, 0.0  ;;  %v2291_v39 = vpop.f32.mrb[51].mxu1  ;;  %vm1796_vm6 = vcmp.gt.f32.partialorder %v1791_v15, 0.0 }
 0x3d4   :  { %v1798_v16 = vmul.f32 1.442695, %v1797_v23 }
 0x3d6   :  { %2477 = vpow2.f32 %v1798_v16 }
 0x3e0   :  { %v2478_v1 = vpop.eup %2477 }
 0x3e1   :  { %v2015_v20 = vadd.f32 -1.0, %v2478_v1 }
 0x3e3   :  { %v1801_v52 = vsel %vm1796_vm6, %v1791_v15, %v2015_v20 }
 0x3e4   :  { %v1802_v34 = vpack.c.bf16 %v1801_v52, %v1801_v52 }
 0x3e6   :  { %2297 = vmatmul.mubr.msk.bf16.vlgmr.msra.gmra.mrb[52].mxu1 %vm1305_vm1, %v1802_v34 }
 0x4b9   :  { %v1863_v21 = vpop.f32.mrb[52].mxu1 }
 0x4ba   :  { %v1864_v4 = vadd.f32 %v2016_v54, %v1863_v21  ;;  %v2298_v29 = vpop.f32.mrb[53].mxu1 }
 0x4bb   :  { %v1866_v25 = vpop.f32.mrb[54].mxu1 }
 0x4bc   :  { %1869 = vst [vmem:[#allocation2] sm:$0xff] %v1864_v4  ;;  %v2299_v9 = vpop.f32.mrb[55].mxu1 }
 0x4bd   :  { %2490 = shalt.err (!%p2487_p4)
}
 0x4be   :  { %s2491_s8 = scalar_lea.hbm %s3429_s9, 128 }
 0x4bf   :  { %p2492_p5 = scmp.ne.s32.totalorder %s3429_s9, %s2491_s8  ;;  %p2495_p6 = scmp.lt.u32.totalorder %s2491_s8, %s3429_s9 }
 0x4c1   :  { %p2497_p7 = pnand %p2495_p6, %p2492_p5 }
 0x4c3   :  { %2500 = shalt.err (!%p2497_p7)
}
 0x4c4   :  { %1879 = dma.vmem_to_hbm [thread:$0]  %s1877_s25, 128, %s3429_s9, [#allocation3]  }
 0x4c5   :  { %2501 = dma.done.wait [#allocation3], 128  }
 0x4c6   :  { %2502 = vsyncadd [#allocation3], 4294967168 }
 0x4c7   :  { %1883 = vsyncpa [#allocation3], 1 }

</bundles_post_ra>
